<compile_context>
chip_gen: v5e
topology: v5e:2x2
jax: 0.10.0
libtpu: 0.0.40
codegen_flags: <defaults>
</compile_context>

<pallas_src>
import functools

import jax
import jax.numpy as jnp
from jax import lax
from jax.experimental import pallas as pl
from jax.experimental.pallas import tpu as pltpu  # noqa: F401  (TPU backend)


# ----------------------------- model config ---------------------------------
DIM = 32
N_HEADS = 4
N_KV_HEADS = 2
HEAD_DIM = 8
HIDDEN_DIM = 64
VOCAB_SIZE = 64
V_PAD = 128                         # lane-dense padded vocab dim for the output
N_LAYERS = 2
NORM_EPS = 1e-5
ROPE_THETA = 10000.0
SEQLENS = [5, 3]                    # sum == 8 tokens
S_TOTAL = sum(SEQLENS)
REPEATS = N_HEADS // N_KV_HEADS
NEG_INF = -1e30


# ------------------------------- fused kernel --------------------------------
def _transformer_kernel(h0_ref, cos_ref, sin_ref, bias_ref, norms_ref,
                        wqkv_ref, wo_ref, w13_ref, w2_ref, wout_ref,
                        logits_ref, *,
                        n_layers, n_heads, head_dim, hidden_dim, eps):
    h = h0_ref[...]                               # (S, D) f32 residual stream
    cos_t = cos_ref[...]                          # (S, H*hd) f32, head-tiled
    sin_t = sin_ref[...]
    bias = bias_ref[...]                          # (S, S) f32 additive mask

    hhd = n_heads * head_dim                      # 32

    def rmsnorm(t, w):                            # element-wise kept in f32
        return t * lax.rsqrt(jnp.mean(t * t, axis=-1, keepdims=True) + eps) * w

    for l in range(n_layers):                     # static unroll (N_LAYERS small)
        an = norms_ref[pl.ds(2 * l, 1), :]        # (1, D) attn-norm gain
        fn = norms_ref[pl.ds(2 * l + 1, 1), :]    # (1, D) ffn-norm gain

        # ---------------- attention ----------------
        xn = rmsnorm(h, an).astype(jnp.bfloat16)                       # one cast
        # single fused projection: [q | q_rot | k | k_rot | v], scale & GQA &
        # RoPE-rotation already folded into the packed weight.
        qkv = jnp.dot(xn, wqkv_ref[l],
                      preferred_element_type=jnp.float32)              # (S, 5*H*hd)

        q = qkv[:, 0 * hhd:1 * hhd]
        qr = qkv[:, 1 * hhd:2 * hhd]
        k = qkv[:, 2 * hhd:3 * hhd]
        kr = qkv[:, 3 * hhd:4 * hhd]
        v = qkv[:, 4 * hhd:5 * hhd]

        # interleaved RoPE == fused multiply-add against tiled cos/sin tables
        qh = (q * cos_t + qr * sin_t).astype(jnp.bfloat16)
        kh = (k * cos_t + kr * sin_t).astype(jnp.bfloat16)
        vb = v.astype(jnp.bfloat16)

        ctx_heads = []
        for hi in range(n_heads):
            sl = slice(hi * head_dim, (hi + 1) * head_dim)
            s = jnp.einsum("qd,kd->qk", qh[:, sl], kh[:, sl],
                           preferred_element_type=jnp.float32) + bias  # (S, S)
            m = jnp.max(s, axis=-1, keepdims=True)
            p = jnp.exp(s - m)
            p = p / jnp.sum(p, axis=-1, keepdims=True)                 # exact div
            ctx_heads.append(jnp.dot(p.astype(jnp.bfloat16), vb[:, sl],
                                     preferred_element_type=jnp.float32))
        # one output-projection matmul with K = H*hd (instead of 4 K=hd ones)
        ctx = jnp.concatenate(ctx_heads, axis=-1).astype(jnp.bfloat16)  # (S, H*hd)
        attn = jnp.dot(ctx, wo_ref[l], preferred_element_type=jnp.float32)
        h = h + attn

        # ---------------- SwiGLU FFN (w1 | w3 fused) ----------------
        hn = rmsnorm(h, fn).astype(jnp.bfloat16)
        up = jnp.dot(hn, w13_ref[l],
                     preferred_element_type=jnp.float32)                # (S, 2*hidden)
        a = up[:, :hidden_dim]
        b = up[:, hidden_dim:]
        silu = a * (1.0 / (1.0 + jnp.exp(-a)))
        h = h + jnp.dot((silu * b).astype(jnp.bfloat16), w2_ref[l],
                        preferred_element_type=jnp.float32)

    # -------- final RMSNorm + vocab projection (lane-dense, padded 128) --------
    on = norms_ref[pl.ds(2 * n_layers, 1), :]
    fin = rmsnorm(h, on).astype(jnp.bfloat16)
    logits_ref[...] = jnp.dot(fin, wout_ref[...],
                              preferred_element_type=jnp.float32)


# ------------------------------- wrapper --------------------------------------
def _full_spec(a):
    nd = a.ndim
    return pl.BlockSpec(tuple(a.shape), lambda: (0,) * nd)


def build_rope_and_mask(seqlens):
    # positions_from_sizes + interleaved cos/sin tables, tiled across heads
    positions = jnp.array([p for s in seqlens for p in range(s)], jnp.float32)
    inv_freq = 1.0 / (ROPE_THETA ** (jnp.arange(0, HEAD_DIM, 2,
                                                dtype=jnp.float32) / HEAD_DIM))
    ang = positions[:, None] * inv_freq[None, :]                # (S, hd/2)
    cos_i = jnp.repeat(jnp.cos(ang), 2, axis=-1)                # (S, hd) interleaved
    sin_i = jnp.repeat(jnp.sin(ang), 2, axis=-1)
    cos_t = jnp.tile(cos_i, (1, N_HEADS))                       # (S, H*hd)
    sin_t = jnp.tile(sin_i, (1, N_HEADS))
    # block-diagonal causal mask as a dense additive bias (S is tiny)
    seg = jnp.array([i for i, s in enumerate(seqlens) for _ in range(s)],
                    jnp.int32)
    idx = jnp.arange(sum(seqlens))
    allowed = (seg[:, None] == seg[None, :]) & (idx[None, :] <= idx[:, None])
    bias = jnp.where(allowed, 0.0, NEG_INF).astype(jnp.float32)
    return cos_t, sin_t, bias


def transformer_forward(params, input_ids, seqlens):
    S = input_ids.shape[0]
    assert sum(seqlens) == S
    # TODO(synk): embedding gather stays in plain JAX (no matmul hot path).
    h0 = jnp.take(params["embedding"], input_ids, axis=0)       # (S, D) f32
    cos_t, sin_t, bias = build_rope_and_mask(seqlens)

    args = (h0, cos_t, sin_t, bias, params["norms"],
            params["w_qkv"], params["w_o"], params["w_13"], params["w_2"],
            params["w_out_pad"])

    kernel = functools.partial(_transformer_kernel,
                               n_layers=N_LAYERS, n_heads=N_HEADS,
                               head_dim=HEAD_DIM, hidden_dim=HIDDEN_DIM,
                               eps=NORM_EPS)

    logits_pad = pl.pallas_call(
        kernel,
        out_shape=jax.ShapeDtypeStruct((S, V_PAD), jnp.float32),
        in_specs=[_full_spec(a) for a in args],
        out_specs=pl.BlockSpec((S, V_PAD), lambda: (0, 0)),
    )(*args)
    return logits_pad[:, :VOCAB_SIZE]


# ------------------------- parameter construction ----------------------------
def init_params(key):
    """Original (unfolded, f32) parameters matching the PyTorch module."""
    def normal(k, shape, std=0.02):
        return std * jax.random.normal(k, shape, dtype=jnp.float32)

    keys = jax.random.split(key, 2 + N_LAYERS)
    emb = normal(keys[0], (VOCAB_SIZE, DIM))
    w_out = normal(keys[1], (DIM, VOCAB_SIZE))

    layers = []
    for li in range(N_LAYERS):
        lk = jax.random.split(keys[2 + li], 7)
        layers.append(dict(
            wq=normal(lk[0], (DIM, N_HEADS * HEAD_DIM)),
            wk=normal(lk[1], (DIM, N_KV_HEADS * HEAD_DIM)),
            wv=normal(lk[2], (DIM, N_KV_HEADS * HEAD_DIM)),
            wo=normal(lk[3], (N_HEADS * HEAD_DIM, DIM)),
            w1=normal(lk[4], (DIM, HIDDEN_DIM)),
            w2=normal(lk[5], (HIDDEN_DIM, DIM)),
            w3=normal(lk[6], (DIM, HIDDEN_DIM)),
            attn_norm=jnp.ones((DIM,), jnp.float32),
            ffn_norm=jnp.ones((DIM,), jnp.float32),
        ))
    return dict(embedding=emb, w_out=w_out,
                out_norm=jnp.ones((DIM,), jnp.float32), layers=layers)


def pack_params(raw):
    """Fold RoPE rotation, GQA repeat and attention scale into fused bf16 slabs."""
    scale = HEAD_DIM ** -0.5
    half = HEAD_DIM // 2

    def rot_cols(w):                    # columns of x -> rotate_pairs(x): (a,b)->(-b,a)
        nh = w.shape[1] // HEAD_DIM
        w4 = w.reshape(DIM, nh, half, 2)
        return jnp.stack([-w4[..., 1], w4[..., 0]], axis=-1).reshape(
            DIM, nh * HEAD_DIM)

    def rep_kv(w):                      # fold repeat_interleave over kv-heads
        w3 = w.reshape(DIM, N_KV_HEADS, HEAD_DIM)
        return jnp.repeat(w3, REPEATS, axis=1).reshape(DIM, N_HEADS * HEAD_DIM)

    w_qkv, w_o, w_13, w_2, norms = [], [], [], [], []
    for L in raw["layers"]:
        wq, wk, wv = L["wq"], L["wk"], L["wv"]
        w_qkv.append(jnp.concatenate(
            [wq * scale, rot_cols(wq) * scale,
             rep_kv(wk), rep_kv(rot_cols(wk)), rep_kv(wv)],
            axis=1).astype(jnp.bfloat16))                       # (D, 5*H*hd)
        w_o.append(L["wo"].astype(jnp.bfloat16))                # (H*hd, D)
        w_13.append(jnp.concatenate([L["w1"], L["w3"]],
                                    axis=1).astype(jnp.bfloat16))  # (D, 2*hidden)
        w_2.append(L["w2"].astype(jnp.bfloat16))                # (hidden, D)
        norms.append(L["attn_norm"])
        norms.append(L["ffn_norm"])
    norms.append(raw["out_norm"])

    w_out_pad = jnp.zeros((DIM, V_PAD), jnp.float32).at[:, :VOCAB_SIZE].set(
        raw["w_out"]).astype(jnp.bfloat16)

    return dict(embedding=raw["embedding"],
                w_qkv=jnp.stack(w_qkv), w_o=jnp.stack(w_o),
                w_13=jnp.stack(w_13), w_2=jnp.stack(w_2),
                norms=jnp.stack(norms),                         # (2L+1, D) f32
                w_out_pad=w_out_pad)


# ------------------- plain-JAX reference (unfolded, f32) ----------------------
def reference_forward(raw, input_ids, seqlens):
    h = jnp.take(raw["embedding"], input_ids, axis=0)
    S = h.shape[0]
    positions = jnp.array([p for s in seqlens for p in range(s)], jnp.float32)
    inv_freq = 1.0 / (ROPE_THETA ** (jnp.arange(0, HEAD_DIM, 2,
                                                dtype=jnp.float32) / HEAD_DIM))
    ang = positions[:, None] * inv_freq[None, :]
    cos, sin = jnp.cos(ang), jnp.sin(ang)                       # (S, hd/2)
    seg = jnp.array([i for i, s in enumerate(seqlens) for _ in range(s)],
                    jnp.int32)
    idx = jnp.arange(S)
    allowed = (seg[:, None] == seg[None, :]) & (idx[None, :] <= idx[:, None])
    scale = HEAD_DIM ** -0.5

    def rms(x, w):
        return x * lax.rsqrt(jnp.mean(x * x, -1, keepdims=True) + NORM_EPS) * w

    def rope(x):                                                # x: (S, nh, hd)
        xr = x.reshape(S, x.shape[1], HEAD_DIM // 2, 2)
        xe, xo = xr[..., 0], xr[..., 1]
        oe = xe * cos[:, None, :] - xo * sin[:, None, :]
        oo = xe * sin[:, None, :] + xo * cos[:, None, :]
        return jnp.stack([oe, oo], axis=-1).reshape(S, x.shape[1], HEAD_DIM)

    for L in raw["layers"]:
        xn = rms(h, L["attn_norm"])
        q = (xn @ L["wq"]).reshape(S, N_HEADS, HEAD_DIM)
        k = (xn @ L["wk"]).reshape(S, N_KV_HEADS, HEAD_DIM)
        v = (xn @ L["wv"]).reshape(S, N_KV_HEADS, HEAD_DIM)
        q, k = rope(q), rope(k)
        k = jnp.repeat(k, REPEATS, axis=1)                      # repeat_interleave
        v = jnp.repeat(v, REPEATS, axis=1)
        s = jnp.einsum("qhd,khd->hqk", q, k) * scale
        s = jnp.where(allowed[None], s, NEG_INF)
        p = jax.nn.softmax(s, axis=-1)
        ctx = jnp.einsum("hqk,khd->qhd", p, v).reshape(S, N_HEADS * HEAD_DIM)
        h = h + ctx @ L["wo"]
        hn = rms(h, L["ffn_norm"])
        h = h + (jax.nn.silu(hn @ L["w1"]) * (hn @ L["w3"])) @ L["w2"]
    return rms(h, raw["out_norm"]) @ raw["w_out"]


# --------------------------------- main ---------------------------------------
if __name__ == "__main__":
    key = jax.random.PRNGKey(0)
    pkey, dkey = jax.random.split(key)
    raw_params = init_params(pkey)
    params = pack_params(raw_params)
    input_ids = jax.random.randint(dkey, (S_TOTAL,), 0, VOCAB_SIZE,
                                   dtype=jnp.int32)

    forward = jax.jit(lambda p, ids: transformer_forward(p, ids, SEQLENS))
    logits = jax.block_until_ready(forward(params, input_ids))

    assert logits.shape == (S_TOTAL, VOCAB_SIZE), logits.shape
    assert logits.dtype == jnp.float32
    assert bool(jnp.all(jnp.isfinite(logits)))

    # validate against the UNFOLDED f32 reference (checks the weight folding too)
    ref = reference_forward(raw_params, input_ids, SEQLENS)
    max_err = float(jnp.max(jnp.abs(logits - ref)))
    assert max_err < 5e-2, f"max abs error vs unfolded f32 reference: {max_err}"

    print("KERNEL_OK")
</pallas_src>

<mosaic_0001>
module attributes {stable_mosaic.version = 11 : i64} {
  func.func @_transformer_kernel(%arg0: memref<8x32xf32, #tpu.memory_space<vmem>>, %arg1: memref<8x32xf32, #tpu.memory_space<vmem>>, %arg2: memref<8x32xf32, #tpu.memory_space<vmem>>, %arg3: memref<8x8xf32, #tpu.memory_space<vmem>>, %arg4: memref<5x32xf32, #tpu.memory_space<vmem>>, %arg5: memref<2x32x160xbf16, #tpu.memory_space<vmem>>, %arg6: memref<2x32x32xbf16, #tpu.memory_space<vmem>>, %arg7: memref<2x32x128xbf16, #tpu.memory_space<vmem>>, %arg8: memref<2x64x32xbf16, #tpu.memory_space<vmem>>, %arg9: memref<32x128xbf16, #tpu.memory_space<vmem>>, %arg10: memref<8x128xf32, #tpu.memory_space<vmem>>) attributes {dimension_semantics = [], scalar_prefetch = 0 : i64, scratch_operands = 0 : i64, tpu.core_type = #tpu.core_type<tc>} {
    %c0 = arith.constant 0 : index
    %c0_0 = arith.constant 0 : index
    %0 = vector.load %arg0[%c0, %c0_0] : memref<8x32xf32, #tpu.memory_space<vmem>>, vector<8x32xf32>
    %c0_1 = arith.constant 0 : index
    %c0_2 = arith.constant 0 : index
    %1 = vector.load %arg1[%c0_1, %c0_2] : memref<8x32xf32, #tpu.memory_space<vmem>>, vector<8x32xf32>
    %c0_3 = arith.constant 0 : index
    %c0_4 = arith.constant 0 : index
    %2 = vector.load %arg2[%c0_3, %c0_4] : memref<8x32xf32, #tpu.memory_space<vmem>>, vector<8x32xf32>
    %c0_5 = arith.constant 0 : index
    %c0_6 = arith.constant 0 : index
    %3 = vector.load %arg3[%c0_5, %c0_6] : memref<8x8xf32, #tpu.memory_space<vmem>>, vector<8x8xf32>
    %c0_7 = arith.constant 0 : index
    %c0_8 = arith.constant 0 : index
    %4 = vector.load %arg4[%c0_7, %c0_8] : memref<5x32xf32, #tpu.memory_space<vmem>>, vector<1x32xf32>
    %c1 = arith.constant 1 : index
    %c0_9 = arith.constant 0 : index
    %5 = vector.load %arg4[%c1, %c0_9] : memref<5x32xf32, #tpu.memory_space<vmem>>, vector<1x32xf32>
    %6 = arith.mulf %0, %0 : vector<8x32xf32>
    %cst = arith.constant dense<0.000000e+00> : vector<8xf32>
    %7 = vector.multi_reduction <add>, %6, %cst [1] : vector<8x32xf32> to vector<8xf32>
    %8 = vector.shape_cast %7 : vector<8xf32> to vector<8x1xf32>
    %cst_10 = arith.constant 3.200000e+01 : f32
    %9 = vector.broadcast %cst_10 : f32 to vector<8x1xf32>
    %10 = arith.divf %8, %9 : vector<8x1xf32>
    %cst_11 = arith.constant 9.99999974E-6 : f32
    %11 = vector.broadcast %cst_11 : f32 to vector<8x1xf32>
    %12 = arith.addf %10, %11 : vector<8x1xf32>
    %13 = math.rsqrt %12 : vector<8x1xf32>
    %14 = vector.broadcast %13 : vector<8x1xf32> to vector<8x32xf32>
    %15 = arith.mulf %0, %14 : vector<8x32xf32>
    %16 = vector.broadcast %4 : vector<1x32xf32> to vector<8x32xf32>
    %17 = arith.mulf %15, %16 : vector<8x32xf32>
    %18 = arith.truncf %17 : vector<8x32xf32> to vector<8x32xbf16>
    %c0_12 = arith.constant 0 : index
    %c0_13 = arith.constant 0 : index
    %c0_14 = arith.constant 0 : index
    %19 = vector.load %arg5[%c0_12, %c0_13, %c0_14] : memref<2x32x160xbf16, #tpu.memory_space<vmem>>, vector<1x32x160xbf16>
    %20 = vector.shape_cast %19 : vector<1x32x160xbf16> to vector<32x160xbf16>
    %cst_15 = arith.constant dense<0.000000e+00> : vector<8x160xf32>
    %21 = tpu.matmul %18, %20, %cst_15 {dimension_numbers = #tpu.dot_dimension_numbers<[1], [0], [0], [1], [0, 0, 1, 1], [], []>} : vector<8x32xbf16>, vector<32x160xbf16>, vector<8x160xf32> -> vector<8x160xf32>
    %22 = vector.extract_strided_slice %21 {offsets = [0, 0], sizes = [8, 32], strides = [1, 1]} : vector<8x160xf32> to vector<8x32xf32>
    %23 = vector.extract_strided_slice %21 {offsets = [0, 32], sizes = [8, 32], strides = [1, 1]} : vector<8x160xf32> to vector<8x32xf32>
    %24 = vector.extract_strided_slice %21 {offsets = [0, 64], sizes = [8, 32], strides = [1, 1]} : vector<8x160xf32> to vector<8x32xf32>
    %25 = vector.extract_strided_slice %21 {offsets = [0, 96], sizes = [8, 32], strides = [1, 1]} : vector<8x160xf32> to vector<8x32xf32>
    %26 = vector.extract_strided_slice %21 {offsets = [0, 128], sizes = [8, 32], strides = [1, 1]} : vector<8x160xf32> to vector<8x32xf32>
    %27 = arith.mulf %22, %1 : vector<8x32xf32>
    %28 = arith.mulf %23, %2 : vector<8x32xf32>
    %29 = arith.addf %27, %28 : vector<8x32xf32>
    %30 = arith.truncf %29 : vector<8x32xf32> to vector<8x32xbf16>
    %31 = arith.mulf %24, %1 : vector<8x32xf32>
    %32 = arith.mulf %25, %2 : vector<8x32xf32>
    %33 = arith.addf %31, %32 : vector<8x32xf32>
    %34 = arith.truncf %33 : vector<8x32xf32> to vector<8x32xbf16>
    %35 = arith.truncf %26 : vector<8x32xf32> to vector<8x32xbf16>
    %36 = vector.extract_strided_slice %30 {offsets = [0, 0], sizes = [8, 8], strides = [1, 1]} : vector<8x32xbf16> to vector<8x8xbf16>
    %37 = vector.extract_strided_slice %34 {offsets = [0, 0], sizes = [8, 8], strides = [1, 1]} : vector<8x32xbf16> to vector<8x8xbf16>
    "tpu.trace_start"() <{level = 10 : i32, message = "qd,kd->qk"}> : () -> ()
    %cst_16 = arith.constant dense<0.000000e+00> : vector<8x8xf32>
    %38 = tpu.matmul %36, %37, %cst_16 {dimension_numbers = #tpu.dot_dimension_numbers<[1], [1], [0], [0], [0, 0, 1, 0], [], []>} : vector<8x8xbf16>, vector<8x8xbf16>, vector<8x8xf32> -> vector<8x8xf32>
    "tpu.trace_stop"() : () -> ()
    %39 = arith.addf %38, %3 : vector<8x8xf32>
    %cst_17 = arith.constant dense<0xFF800000> : vector<8xf32>
    %40 = vector.multi_reduction <maximumf>, %39, %cst_17 [1] : vector<8x8xf32> to vector<8xf32>
    %41 = vector.shape_cast %40 : vector<8xf32> to vector<8x1xf32>
    %42 = vector.broadcast %41 : vector<8x1xf32> to vector<8x8xf32>
    %43 = arith.subf %39, %42 : vector<8x8xf32>
    %44 = math.exp %43 : vector<8x8xf32>
    %cst_18 = arith.constant dense<0.000000e+00> : vector<8xf32>
    %45 = vector.multi_reduction <add>, %44, %cst_18 [1] : vector<8x8xf32> to vector<8xf32>
    %46 = vector.shape_cast %45 : vector<8xf32> to vector<8x1xf32>
    %47 = vector.broadcast %46 : vector<8x1xf32> to vector<8x8xf32>
    %48 = arith.divf %44, %47 : vector<8x8xf32>
    %49 = arith.truncf %48 : vector<8x8xf32> to vector<8x8xbf16>
    %50 = vector.extract_strided_slice %35 {offsets = [0, 0], sizes = [8, 8], strides = [1, 1]} : vector<8x32xbf16> to vector<8x8xbf16>
    %cst_19 = arith.constant dense<0.000000e+00> : vector<8x8xf32>
    %51 = tpu.matmul %49, %50, %cst_19 {dimension_numbers = #tpu.dot_dimension_numbers<[1], [0], [0], [1], [0, 0, 1, 1], [], []>} : vector<8x8xbf16>, vector<8x8xbf16>, vector<8x8xf32> -> vector<8x8xf32>
    %52 = vector.extract_strided_slice %30 {offsets = [0, 8], sizes = [8, 8], strides = [1, 1]} : vector<8x32xbf16> to vector<8x8xbf16>
    %53 = vector.extract_strided_slice %34 {offsets = [0, 8], sizes = [8, 8], strides = [1, 1]} : vector<8x32xbf16> to vector<8x8xbf16>
    "tpu.trace_start"() <{level = 10 : i32, message = "qd,kd->qk"}> : () -> ()
    %cst_20 = arith.constant dense<0.000000e+00> : vector<8x8xf32>
    %54 = tpu.matmul %52, %53, %cst_20 {dimension_numbers = #tpu.dot_dimension_numbers<[1], [1], [0], [0], [0, 0, 1, 0], [], []>} : vector<8x8xbf16>, vector<8x8xbf16>, vector<8x8xf32> -> vector<8x8xf32>
    "tpu.trace_stop"() : () -> ()
    %55 = arith.addf %54, %3 : vector<8x8xf32>
    %cst_21 = arith.constant dense<0xFF800000> : vector<8xf32>
    %56 = vector.multi_reduction <maximumf>, %55, %cst_21 [1] : vector<8x8xf32> to vector<8xf32>
    %57 = vector.shape_cast %56 : vector<8xf32> to vector<8x1xf32>
    %58 = vector.broadcast %57 : vector<8x1xf32> to vector<8x8xf32>
    %59 = arith.subf %55, %58 : vector<8x8xf32>
    %60 = math.exp %59 : vector<8x8xf32>
    %cst_22 = arith.constant dense<0.000000e+00> : vector<8xf32>
    %61 = vector.multi_reduction <add>, %60, %cst_22 [1] : vector<8x8xf32> to vector<8xf32>
    %62 = vector.shape_cast %61 : vector<8xf32> to vector<8x1xf32>
    %63 = vector.broadcast %62 : vector<8x1xf32> to vector<8x8xf32>
    %64 = arith.divf %60, %63 : vector<8x8xf32>
    %65 = arith.truncf %64 : vector<8x8xf32> to vector<8x8xbf16>
    %66 = vector.extract_strided_slice %35 {offsets = [0, 8], sizes = [8, 8], strides = [1, 1]} : vector<8x32xbf16> to vector<8x8xbf16>
    %cst_23 = arith.constant dense<0.000000e+00> : vector<8x8xf32>
    %67 = tpu.matmul %65, %66, %cst_23 {dimension_numbers = #tpu.dot_dimension_numbers<[1], [0], [0], [1], [0, 0, 1, 1], [], []>} : vector<8x8xbf16>, vector<8x8xbf16>, vector<8x8xf32> -> vector<8x8xf32>
    %68 = vector.extract_strided_slice %30 {offsets = [0, 16], sizes = [8, 8], strides = [1, 1]} : vector<8x32xbf16> to vector<8x8xbf16>
    %69 = vector.extract_strided_slice %34 {offsets = [0, 16], sizes = [8, 8], strides = [1, 1]} : vector<8x32xbf16> to vector<8x8xbf16>
    "tpu.trace_start"() <{level = 10 : i32, message = "qd,kd->qk"}> : () -> ()
    %cst_24 = arith.constant dense<0.000000e+00> : vector<8x8xf32>
    %70 = tpu.matmul %68, %69, %cst_24 {dimension_numbers = #tpu.dot_dimension_numbers<[1], [1], [0], [0], [0, 0, 1, 0], [], []>} : vector<8x8xbf16>, vector<8x8xbf16>, vector<8x8xf32> -> vector<8x8xf32>
    "tpu.trace_stop"() : () -> ()
    %71 = arith.addf %70, %3 : vector<8x8xf32>
    %cst_25 = arith.constant dense<0xFF800000> : vector<8xf32>
    %72 = vector.multi_reduction <maximumf>, %71, %cst_25 [1] : vector<8x8xf32> to vector<8xf32>
    %73 = vector.shape_cast %72 : vector<8xf32> to vector<8x1xf32>
    %74 = vector.broadcast %73 : vector<8x1xf32> to vector<8x8xf32>
    %75 = arith.subf %71, %74 : vector<8x8xf32>
    %76 = math.exp %75 : vector<8x8xf32>
    %cst_26 = arith.constant dense<0.000000e+00> : vector<8xf32>
    %77 = vector.multi_reduction <add>, %76, %cst_26 [1] : vector<8x8xf32> to vector<8xf32>
    %78 = vector.shape_cast %77 : vector<8xf32> to vector<8x1xf32>
    %79 = vector.broadcast %78 : vector<8x1xf32> to vector<8x8xf32>
    %80 = arith.divf %76, %79 : vector<8x8xf32>
    %81 = arith.truncf %80 : vector<8x8xf32> to vector<8x8xbf16>
    %82 = vector.extract_strided_slice %35 {offsets = [0, 16], sizes = [8, 8], strides = [1, 1]} : vector<8x32xbf16> to vector<8x8xbf16>
    %cst_27 = arith.constant dense<0.000000e+00> : vector<8x8xf32>
    %83 = tpu.matmul %81, %82, %cst_27 {dimension_numbers = #tpu.dot_dimension_numbers<[1], [0], [0], [1], [0, 0, 1, 1], [], []>} : vector<8x8xbf16>, vector<8x8xbf16>, vector<8x8xf32> -> vector<8x8xf32>
    %84 = vector.extract_strided_slice %30 {offsets = [0, 24], sizes = [8, 8], strides = [1, 1]} : vector<8x32xbf16> to vector<8x8xbf16>
    %85 = vector.extract_strided_slice %34 {offsets = [0, 24], sizes = [8, 8], strides = [1, 1]} : vector<8x32xbf16> to vector<8x8xbf16>
    "tpu.trace_start"() <{level = 10 : i32, message = "qd,kd->qk"}> : () -> ()
    %cst_28 = arith.constant dense<0.000000e+00> : vector<8x8xf32>
    %86 = tpu.matmul %84, %85, %cst_28 {dimension_numbers = #tpu.dot_dimension_numbers<[1], [1], [0], [0], [0, 0, 1, 0], [], []>} : vector<8x8xbf16>, vector<8x8xbf16>, vector<8x8xf32> -> vector<8x8xf32>
    "tpu.trace_stop"() : () -> ()
    %87 = arith.addf %86, %3 : vector<8x8xf32>
    %cst_29 = arith.constant dense<0xFF800000> : vector<8xf32>
    %88 = vector.multi_reduction <maximumf>, %87, %cst_29 [1] : vector<8x8xf32> to vector<8xf32>
    %89 = vector.shape_cast %88 : vector<8xf32> to vector<8x1xf32>
    %90 = vector.broadcast %89 : vector<8x1xf32> to vector<8x8xf32>
    %91 = arith.subf %87, %90 : vector<8x8xf32>
    %92 = math.exp %91 : vector<8x8xf32>
    %cst_30 = arith.constant dense<0.000000e+00> : vector<8xf32>
    %93 = vector.multi_reduction <add>, %92, %cst_30 [1] : vector<8x8xf32> to vector<8xf32>
    %94 = vector.shape_cast %93 : vector<8xf32> to vector<8x1xf32>
    %95 = vector.broadcast %94 : vector<8x1xf32> to vector<8x8xf32>
    %96 = arith.divf %92, %95 : vector<8x8xf32>
    %97 = arith.truncf %96 : vector<8x8xf32> to vector<8x8xbf16>
    %98 = vector.extract_strided_slice %35 {offsets = [0, 24], sizes = [8, 8], strides = [1, 1]} : vector<8x32xbf16> to vector<8x8xbf16>
    %cst_31 = arith.constant dense<0.000000e+00> : vector<8x8xf32>
    %99 = tpu.matmul %97, %98, %cst_31 {dimension_numbers = #tpu.dot_dimension_numbers<[1], [0], [0], [1], [0, 0, 1, 1], [], []>} : vector<8x8xbf16>, vector<8x8xbf16>, vector<8x8xf32> -> vector<8x8xf32>
    %100 = tpu.concatenate %51, %67, %83, %99 in 1 : vector<8x8xf32>, vector<8x8xf32>, vector<8x8xf32>, vector<8x8xf32> -> vector<8x32xf32>
    %101 = arith.truncf %100 : vector<8x32xf32> to vector<8x32xbf16>
    %c0_32 = arith.constant 0 : index
    %c0_33 = arith.constant 0 : index
    %c0_34 = arith.constant 0 : index
    %102 = vector.load %arg6[%c0_32, %c0_33, %c0_34] : memref<2x32x32xbf16, #tpu.memory_space<vmem>>, vector<1x32x32xbf16>
    %103 = vector.shape_cast %102 : vector<1x32x32xbf16> to vector<32x32xbf16>
    %cst_35 = arith.constant dense<0.000000e+00> : vector<8x32xf32>
    %104 = tpu.matmul %101, %103, %cst_35 {dimension_numbers = #tpu.dot_dimension_numbers<[1], [0], [0], [1], [0, 0, 1, 1], [], []>} : vector<8x32xbf16>, vector<32x32xbf16>, vector<8x32xf32> -> vector<8x32xf32>
    %105 = arith.addf %0, %104 : vector<8x32xf32>
    %106 = arith.mulf %105, %105 : vector<8x32xf32>
    %cst_36 = arith.constant dense<0.000000e+00> : vector<8xf32>
    %107 = vector.multi_reduction <add>, %106, %cst_36 [1] : vector<8x32xf32> to vector<8xf32>
    %108 = vector.shape_cast %107 : vector<8xf32> to vector<8x1xf32>
    %cst_37 = arith.constant 3.200000e+01 : f32
    %109 = vector.broadcast %cst_37 : f32 to vector<8x1xf32>
    %110 = arith.divf %108, %109 : vector<8x1xf32>
    %cst_38 = arith.constant 9.99999974E-6 : f32
    %111 = vector.broadcast %cst_38 : f32 to vector<8x1xf32>
    %112 = arith.addf %110, %111 : vector<8x1xf32>
    %113 = math.rsqrt %112 : vector<8x1xf32>
    %114 = vector.broadcast %113 : vector<8x1xf32> to vector<8x32xf32>
    %115 = arith.mulf %105, %114 : vector<8x32xf32>
    %116 = vector.broadcast %5 : vector<1x32xf32> to vector<8x32xf32>
    %117 = arith.mulf %115, %116 : vector<8x32xf32>
    %118 = arith.truncf %117 : vector<8x32xf32> to vector<8x32xbf16>
    %c0_39 = arith.constant 0 : index
    %c0_40 = arith.constant 0 : index
    %c0_41 = arith.constant 0 : index
    %119 = vector.load %arg7[%c0_39, %c0_40, %c0_41] : memref<2x32x128xbf16, #tpu.memory_space<vmem>>, vector<1x32x128xbf16>
    %120 = vector.shape_cast %119 : vector<1x32x128xbf16> to vector<32x128xbf16>
    %cst_42 = arith.constant dense<0.000000e+00> : vector<8x128xf32>
    %121 = tpu.matmul %118, %120, %cst_42 {dimension_numbers = #tpu.dot_dimension_numbers<[1], [0], [0], [1], [0, 0, 1, 1], [], []>} : vector<8x32xbf16>, vector<32x128xbf16>, vector<8x128xf32> -> vector<8x128xf32>
    %122 = vector.extract_strided_slice %121 {offsets = [0, 0], sizes = [8, 64], strides = [1, 1]} : vector<8x128xf32> to vector<8x64xf32>
    %123 = vector.extract_strided_slice %121 {offsets = [0, 64], sizes = [8, 64], strides = [1, 1]} : vector<8x128xf32> to vector<8x64xf32>
    %cst_43 = arith.constant 0.000000e+00 : f32
    %124 = vector.broadcast %cst_43 : f32 to vector<8x64xf32>
    %125 = arith.subf %124, %122 : vector<8x64xf32>
    %126 = math.exp %125 : vector<8x64xf32>
    %cst_44 = arith.constant 1.000000e+00 : f32
    %127 = vector.broadcast %cst_44 : f32 to vector<8x64xf32>
    %128 = arith.addf %127, %126 : vector<8x64xf32>
    %cst_45 = arith.constant 1.000000e+00 : f32
    %129 = vector.broadcast %cst_45 : f32 to vector<8x64xf32>
    %130 = arith.divf %129, %128 : vector<8x64xf32>
    %131 = arith.mulf %122, %130 : vector<8x64xf32>
    %132 = arith.mulf %131, %123 : vector<8x64xf32>
    %133 = arith.truncf %132 : vector<8x64xf32> to vector<8x64xbf16>
    %c0_46 = arith.constant 0 : index
    %c0_47 = arith.constant 0 : index
    %c0_48 = arith.constant 0 : index
    %134 = vector.load %arg8[%c0_46, %c0_47, %c0_48] : memref<2x64x32xbf16, #tpu.memory_space<vmem>>, vector<1x64x32xbf16>
    %135 = vector.shape_cast %134 : vector<1x64x32xbf16> to vector<64x32xbf16>
    %cst_49 = arith.constant dense<0.000000e+00> : vector<8x32xf32>
    %136 = tpu.matmul %133, %135, %cst_49 {dimension_numbers = #tpu.dot_dimension_numbers<[1], [0], [0], [1], [0, 0, 1, 1], [], []>} : vector<8x64xbf16>, vector<64x32xbf16>, vector<8x32xf32> -> vector<8x32xf32>
    %137 = arith.addf %105, %136 : vector<8x32xf32>
    %c2 = arith.constant 2 : index
    %c0_50 = arith.constant 0 : index
    %138 = vector.load %arg4[%c2, %c0_50] : memref<5x32xf32, #tpu.memory_space<vmem>>, vector<1x32xf32>
    %c3 = arith.constant 3 : index
    %c0_51 = arith.constant 0 : index
    %139 = vector.load %arg4[%c3, %c0_51] : memref<5x32xf32, #tpu.memory_space<vmem>>, vector<1x32xf32>
    %140 = arith.mulf %137, %137 : vector<8x32xf32>
    %cst_52 = arith.constant dense<0.000000e+00> : vector<8xf32>
    %141 = vector.multi_reduction <add>, %140, %cst_52 [1] : vector<8x32xf32> to vector<8xf32>
    %142 = vector.shape_cast %141 : vector<8xf32> to vector<8x1xf32>
    %cst_53 = arith.constant 3.200000e+01 : f32
    %143 = vector.broadcast %cst_53 : f32 to vector<8x1xf32>
    %144 = arith.divf %142, %143 : vector<8x1xf32>
    %cst_54 = arith.constant 9.99999974E-6 : f32
    %145 = vector.broadcast %cst_54 : f32 to vector<8x1xf32>
    %146 = arith.addf %144, %145 : vector<8x1xf32>
    %147 = math.rsqrt %146 : vector<8x1xf32>
    %148 = vector.broadcast %147 : vector<8x1xf32> to vector<8x32xf32>
    %149 = arith.mulf %137, %148 : vector<8x32xf32>
    %150 = vector.broadcast %138 : vector<1x32xf32> to vector<8x32xf32>
    %151 = arith.mulf %149, %150 : vector<8x32xf32>
    %152 = arith.truncf %151 : vector<8x32xf32> to vector<8x32xbf16>
    %c1_55 = arith.constant 1 : index
    %c0_56 = arith.constant 0 : index
    %c0_57 = arith.constant 0 : index
    %153 = vector.load %arg5[%c1_55, %c0_56, %c0_57] : memref<2x32x160xbf16, #tpu.memory_space<vmem>>, vector<1x32x160xbf16>
    %154 = vector.shape_cast %153 : vector<1x32x160xbf16> to vector<32x160xbf16>
    %cst_58 = arith.constant dense<0.000000e+00> : vector<8x160xf32>
    %155 = tpu.matmul %152, %154, %cst_58 {dimension_numbers = #tpu.dot_dimension_numbers<[1], [0], [0], [1], [0, 0, 1, 1], [], []>} : vector<8x32xbf16>, vector<32x160xbf16>, vector<8x160xf32> -> vector<8x160xf32>
    %156 = vector.extract_strided_slice %155 {offsets = [0, 0], sizes = [8, 32], strides = [1, 1]} : vector<8x160xf32> to vector<8x32xf32>
    %157 = vector.extract_strided_slice %155 {offsets = [0, 32], sizes = [8, 32], strides = [1, 1]} : vector<8x160xf32> to vector<8x32xf32>
    %158 = vector.extract_strided_slice %155 {offsets = [0, 64], sizes = [8, 32], strides = [1, 1]} : vector<8x160xf32> to vector<8x32xf32>
    %159 = vector.extract_strided_slice %155 {offsets = [0, 96], sizes = [8, 32], strides = [1, 1]} : vector<8x160xf32> to vector<8x32xf32>
    %160 = vector.extract_strided_slice %155 {offsets = [0, 128], sizes = [8, 32], strides = [1, 1]} : vector<8x160xf32> to vector<8x32xf32>
    %161 = arith.mulf %156, %1 : vector<8x32xf32>
    %162 = arith.mulf %157, %2 : vector<8x32xf32>
    %163 = arith.addf %161, %162 : vector<8x32xf32>
    %164 = arith.truncf %163 : vector<8x32xf32> to vector<8x32xbf16>
    %165 = arith.mulf %158, %1 : vector<8x32xf32>
    %166 = arith.mulf %159, %2 : vector<8x32xf32>
    %167 = arith.addf %165, %166 : vector<8x32xf32>
    %168 = arith.truncf %167 : vector<8x32xf32> to vector<8x32xbf16>
    %169 = arith.truncf %160 : vector<8x32xf32> to vector<8x32xbf16>
    %170 = vector.extract_strided_slice %164 {offsets = [0, 0], sizes = [8, 8], strides = [1, 1]} : vector<8x32xbf16> to vector<8x8xbf16>
    %171 = vector.extract_strided_slice %168 {offsets = [0, 0], sizes = [8, 8], strides = [1, 1]} : vector<8x32xbf16> to vector<8x8xbf16>
    "tpu.trace_start"() <{level = 10 : i32, message = "qd,kd->qk"}> : () -> ()
    %cst_59 = arith.constant dense<0.000000e+00> : vector<8x8xf32>
    %172 = tpu.matmul %170, %171, %cst_59 {dimension_numbers = #tpu.dot_dimension_numbers<[1], [1], [0], [0], [0, 0, 1, 0], [], []>} : vector<8x8xbf16>, vector<8x8xbf16>, vector<8x8xf32> -> vector<8x8xf32>
    "tpu.trace_stop"() : () -> ()
    %173 = arith.addf %172, %3 : vector<8x8xf32>
    %cst_60 = arith.constant dense<0xFF800000> : vector<8xf32>
    %174 = vector.multi_reduction <maximumf>, %173, %cst_60 [1] : vector<8x8xf32> to vector<8xf32>
    %175 = vector.shape_cast %174 : vector<8xf32> to vector<8x1xf32>
    %176 = vector.broadcast %175 : vector<8x1xf32> to vector<8x8xf32>
    %177 = arith.subf %173, %176 : vector<8x8xf32>
    %178 = math.exp %177 : vector<8x8xf32>
    %cst_61 = arith.constant dense<0.000000e+00> : vector<8xf32>
    %179 = vector.multi_reduction <add>, %178, %cst_61 [1] : vector<8x8xf32> to vector<8xf32>
    %180 = vector.shape_cast %179 : vector<8xf32> to vector<8x1xf32>
    %181 = vector.broadcast %180 : vector<8x1xf32> to vector<8x8xf32>
    %182 = arith.divf %178, %181 : vector<8x8xf32>
    %183 = arith.truncf %182 : vector<8x8xf32> to vector<8x8xbf16>
    %184 = vector.extract_strided_slice %169 {offsets = [0, 0], sizes = [8, 8], strides = [1, 1]} : vector<8x32xbf16> to vector<8x8xbf16>
    %cst_62 = arith.constant dense<0.000000e+00> : vector<8x8xf32>
    %185 = tpu.matmul %183, %184, %cst_62 {dimension_numbers = #tpu.dot_dimension_numbers<[1], [0], [0], [1], [0, 0, 1, 1], [], []>} : vector<8x8xbf16>, vector<8x8xbf16>, vector<8x8xf32> -> vector<8x8xf32>
    %186 = vector.extract_strided_slice %164 {offsets = [0, 8], sizes = [8, 8], strides = [1, 1]} : vector<8x32xbf16> to vector<8x8xbf16>
    %187 = vector.extract_strided_slice %168 {offsets = [0, 8], sizes = [8, 8], strides = [1, 1]} : vector<8x32xbf16> to vector<8x8xbf16>
    "tpu.trace_start"() <{level = 10 : i32, message = "qd,kd->qk"}> : () -> ()
    %cst_63 = arith.constant dense<0.000000e+00> : vector<8x8xf32>
    %188 = tpu.matmul %186, %187, %cst_63 {dimension_numbers = #tpu.dot_dimension_numbers<[1], [1], [0], [0], [0, 0, 1, 0], [], []>} : vector<8x8xbf16>, vector<8x8xbf16>, vector<8x8xf32> -> vector<8x8xf32>
    "tpu.trace_stop"() : () -> ()
    %189 = arith.addf %188, %3 : vector<8x8xf32>
    %cst_64 = arith.constant dense<0xFF800000> : vector<8xf32>
    %190 = vector.multi_reduction <maximumf>, %189, %cst_64 [1] : vector<8x8xf32> to vector<8xf32>
    %191 = vector.shape_cast %190 : vector<8xf32> to vector<8x1xf32>
    %192 = vector.broadcast %191 : vector<8x1xf32> to vector<8x8xf32>
    %193 = arith.subf %189, %192 : vector<8x8xf32>
    %194 = math.exp %193 : vector<8x8xf32>
    %cst_65 = arith.constant dense<0.000000e+00> : vector<8xf32>
    %195 = vector.multi_reduction <add>, %194, %cst_65 [1] : vector<8x8xf32> to vector<8xf32>
    %196 = vector.shape_cast %195 : vector<8xf32> to vector<8x1xf32>
    %197 = vector.broadcast %196 : vector<8x1xf32> to vector<8x8xf32>
    %198 = arith.divf %194, %197 : vector<8x8xf32>
    %199 = arith.truncf %198 : vector<8x8xf32> to vector<8x8xbf16>
    %200 = vector.extract_strided_slice %169 {offsets = [0, 8], sizes = [8, 8], strides = [1, 1]} : vector<8x32xbf16> to vector<8x8xbf16>
    %cst_66 = arith.constant dense<0.000000e+00> : vector<8x8xf32>
    %201 = tpu.matmul %199, %200, %cst_66 {dimension_numbers = #tpu.dot_dimension_numbers<[1], [0], [0], [1], [0, 0, 1, 1], [], []>} : vector<8x8xbf16>, vector<8x8xbf16>, vector<8x8xf32> -> vector<8x8xf32>
    %202 = vector.extract_strided_slice %164 {offsets = [0, 16], sizes = [8, 8], strides = [1, 1]} : vector<8x32xbf16> to vector<8x8xbf16>
    %203 = vector.extract_strided_slice %168 {offsets = [0, 16], sizes = [8, 8], strides = [1, 1]} : vector<8x32xbf16> to vector<8x8xbf16>
    "tpu.trace_start"() <{level = 10 : i32, message = "qd,kd->qk"}> : () -> ()
    %cst_67 = arith.constant dense<0.000000e+00> : vector<8x8xf32>
    %204 = tpu.matmul %202, %203, %cst_67 {dimension_numbers = #tpu.dot_dimension_numbers<[1], [1], [0], [0], [0, 0, 1, 0], [], []>} : vector<8x8xbf16>, vector<8x8xbf16>, vector<8x8xf32> -> vector<8x8xf32>
    "tpu.trace_stop"() : () -> ()
    %205 = arith.addf %204, %3 : vector<8x8xf32>
    %cst_68 = arith.constant dense<0xFF800000> : vector<8xf32>
    %206 = vector.multi_reduction <maximumf>, %205, %cst_68 [1] : vector<8x8xf32> to vector<8xf32>
    %207 = vector.shape_cast %206 : vector<8xf32> to vector<8x1xf32>
    %208 = vector.broadcast %207 : vector<8x1xf32> to vector<8x8xf32>
    %209 = arith.subf %205, %208 : vector<8x8xf32>
    %210 = math.exp %209 : vector<8x8xf32>
    %cst_69 = arith.constant dense<0.000000e+00> : vector<8xf32>
    %211 = vector.multi_reduction <add>, %210, %cst_69 [1] : vector<8x8xf32> to vector<8xf32>
    %212 = vector.shape_cast %211 : vector<8xf32> to vector<8x1xf32>
    %213 = vector.broadcast %212 : vector<8x1xf32> to vector<8x8xf32>
    %214 = arith.divf %210, %213 : vector<8x8xf32>
    %215 = arith.truncf %214 : vector<8x8xf32> to vector<8x8xbf16>
    %216 = vector.extract_strided_slice %169 {offsets = [0, 16], sizes = [8, 8], strides = [1, 1]} : vector<8x32xbf16> to vector<8x8xbf16>
    %cst_70 = arith.constant dense<0.000000e+00> : vector<8x8xf32>
    %217 = tpu.matmul %215, %216, %cst_70 {dimension_numbers = #tpu.dot_dimension_numbers<[1], [0], [0], [1], [0, 0, 1, 1], [], []>} : vector<8x8xbf16>, vector<8x8xbf16>, vector<8x8xf32> -> vector<8x8xf32>
    %218 = vector.extract_strided_slice %164 {offsets = [0, 24], sizes = [8, 8], strides = [1, 1]} : vector<8x32xbf16> to vector<8x8xbf16>
    %219 = vector.extract_strided_slice %168 {offsets = [0, 24], sizes = [8, 8], strides = [1, 1]} : vector<8x32xbf16> to vector<8x8xbf16>
    "tpu.trace_start"() <{level = 10 : i32, message = "qd,kd->qk"}> : () -> ()
    %cst_71 = arith.constant dense<0.000000e+00> : vector<8x8xf32>
    %220 = tpu.matmul %218, %219, %cst_71 {dimension_numbers = #tpu.dot_dimension_numbers<[1], [1], [0], [0], [0, 0, 1, 0], [], []>} : vector<8x8xbf16>, vector<8x8xbf16>, vector<8x8xf32> -> vector<8x8xf32>
    "tpu.trace_stop"() : () -> ()
    %221 = arith.addf %220, %3 : vector<8x8xf32>
    %cst_72 = arith.constant dense<0xFF800000> : vector<8xf32>
    %222 = vector.multi_reduction <maximumf>, %221, %cst_72 [1] : vector<8x8xf32> to vector<8xf32>
    %223 = vector.shape_cast %222 : vector<8xf32> to vector<8x1xf32>
    %224 = vector.broadcast %223 : vector<8x1xf32> to vector<8x8xf32>
    %225 = arith.subf %221, %224 : vector<8x8xf32>
    %226 = math.exp %225 : vector<8x8xf32>
    %cst_73 = arith.constant dense<0.000000e+00> : vector<8xf32>
    %227 = vector.multi_reduction <add>, %226, %cst_73 [1] : vector<8x8xf32> to vector<8xf32>
    %228 = vector.shape_cast %227 : vector<8xf32> to vector<8x1xf32>
    %229 = vector.broadcast %228 : vector<8x1xf32> to vector<8x8xf32>
    %230 = arith.divf %226, %229 : vector<8x8xf32>
    %231 = arith.truncf %230 : vector<8x8xf32> to vector<8x8xbf16>
    %232 = vector.extract_strided_slice %169 {offsets = [0, 24], sizes = [8, 8], strides = [1, 1]} : vector<8x32xbf16> to vector<8x8xbf16>
    %cst_74 = arith.constant dense<0.000000e+00> : vector<8x8xf32>
    %233 = tpu.matmul %231, %232, %cst_74 {dimension_numbers = #tpu.dot_dimension_numbers<[1], [0], [0], [1], [0, 0, 1, 1], [], []>} : vector<8x8xbf16>, vector<8x8xbf16>, vector<8x8xf32> -> vector<8x8xf32>
    %234 = tpu.concatenate %185, %201, %217, %233 in 1 : vector<8x8xf32>, vector<8x8xf32>, vector<8x8xf32>, vector<8x8xf32> -> vector<8x32xf32>
    %235 = arith.truncf %234 : vector<8x32xf32> to vector<8x32xbf16>
    %c1_75 = arith.constant 1 : index
    %c0_76 = arith.constant 0 : index
    %c0_77 = arith.constant 0 : index
    %236 = vector.load %arg6[%c1_75, %c0_76, %c0_77] : memref<2x32x32xbf16, #tpu.memory_space<vmem>>, vector<1x32x32xbf16>
    %237 = vector.shape_cast %236 : vector<1x32x32xbf16> to vector<32x32xbf16>
    %cst_78 = arith.constant dense<0.000000e+00> : vector<8x32xf32>
    %238 = tpu.matmul %235, %237, %cst_78 {dimension_numbers = #tpu.dot_dimension_numbers<[1], [0], [0], [1], [0, 0, 1, 1], [], []>} : vector<8x32xbf16>, vector<32x32xbf16>, vector<8x32xf32> -> vector<8x32xf32>
    %239 = arith.addf %137, %238 : vector<8x32xf32>
    %240 = arith.mulf %239, %239 : vector<8x32xf32>
    %cst_79 = arith.constant dense<0.000000e+00> : vector<8xf32>
    %241 = vector.multi_reduction <add>, %240, %cst_79 [1] : vector<8x32xf32> to vector<8xf32>
    %242 = vector.shape_cast %241 : vector<8xf32> to vector<8x1xf32>
    %cst_80 = arith.constant 3.200000e+01 : f32
    %243 = vector.broadcast %cst_80 : f32 to vector<8x1xf32>
    %244 = arith.divf %242, %243 : vector<8x1xf32>
    %cst_81 = arith.constant 9.99999974E-6 : f32
    %245 = vector.broadcast %cst_81 : f32 to vector<8x1xf32>
    %246 = arith.addf %244, %245 : vector<8x1xf32>
    %247 = math.rsqrt %246 : vector<8x1xf32>
    %248 = vector.broadcast %247 : vector<8x1xf32> to vector<8x32xf32>
    %249 = arith.mulf %239, %248 : vector<8x32xf32>
    %250 = vector.broadcast %139 : vector<1x32xf32> to vector<8x32xf32>
    %251 = arith.mulf %249, %250 : vector<8x32xf32>
    %252 = arith.truncf %251 : vector<8x32xf32> to vector<8x32xbf16>
    %c1_82 = arith.constant 1 : index
    %c0_83 = arith.constant 0 : index
    %c0_84 = arith.constant 0 : index
    %253 = vector.load %arg7[%c1_82, %c0_83, %c0_84] : memref<2x32x128xbf16, #tpu.memory_space<vmem>>, vector<1x32x128xbf16>
    %254 = vector.shape_cast %253 : vector<1x32x128xbf16> to vector<32x128xbf16>
    %cst_85 = arith.constant dense<0.000000e+00> : vector<8x128xf32>
    %255 = tpu.matmul %252, %254, %cst_85 {dimension_numbers = #tpu.dot_dimension_numbers<[1], [0], [0], [1], [0, 0, 1, 1], [], []>} : vector<8x32xbf16>, vector<32x128xbf16>, vector<8x128xf32> -> vector<8x128xf32>
    %256 = vector.extract_strided_slice %255 {offsets = [0, 0], sizes = [8, 64], strides = [1, 1]} : vector<8x128xf32> to vector<8x64xf32>
    %257 = vector.extract_strided_slice %255 {offsets = [0, 64], sizes = [8, 64], strides = [1, 1]} : vector<8x128xf32> to vector<8x64xf32>
    %cst_86 = arith.constant 0.000000e+00 : f32
    %258 = vector.broadcast %cst_86 : f32 to vector<8x64xf32>
    %259 = arith.subf %258, %256 : vector<8x64xf32>
    %260 = math.exp %259 : vector<8x64xf32>
    %cst_87 = arith.constant 1.000000e+00 : f32
    %261 = vector.broadcast %cst_87 : f32 to vector<8x64xf32>
    %262 = arith.addf %261, %260 : vector<8x64xf32>
    %cst_88 = arith.constant 1.000000e+00 : f32
    %263 = vector.broadcast %cst_88 : f32 to vector<8x64xf32>
    %264 = arith.divf %263, %262 : vector<8x64xf32>
    %265 = arith.mulf %256, %264 : vector<8x64xf32>
    %266 = arith.mulf %265, %257 : vector<8x64xf32>
    %267 = arith.truncf %266 : vector<8x64xf32> to vector<8x64xbf16>
    %c1_89 = arith.constant 1 : index
    %c0_90 = arith.constant 0 : index
    %c0_91 = arith.constant 0 : index
    %268 = vector.load %arg8[%c1_89, %c0_90, %c0_91] : memref<2x64x32xbf16, #tpu.memory_space<vmem>>, vector<1x64x32xbf16>
    %269 = vector.shape_cast %268 : vector<1x64x32xbf16> to vector<64x32xbf16>
    %cst_92 = arith.constant dense<0.000000e+00> : vector<8x32xf32>
    %270 = tpu.matmul %267, %269, %cst_92 {dimension_numbers = #tpu.dot_dimension_numbers<[1], [0], [0], [1], [0, 0, 1, 1], [], []>} : vector<8x64xbf16>, vector<64x32xbf16>, vector<8x32xf32> -> vector<8x32xf32>
    %271 = arith.addf %239, %270 : vector<8x32xf32>
    %c4 = arith.constant 4 : index
    %c0_93 = arith.constant 0 : index
    %272 = vector.load %arg4[%c4, %c0_93] : memref<5x32xf32, #tpu.memory_space<vmem>>, vector<1x32xf32>
    %273 = arith.mulf %271, %271 : vector<8x32xf32>
    %cst_94 = arith.constant dense<0.000000e+00> : vector<8xf32>
    %274 = vector.multi_reduction <add>, %273, %cst_94 [1] : vector<8x32xf32> to vector<8xf32>
    %275 = vector.shape_cast %274 : vector<8xf32> to vector<8x1xf32>
    %cst_95 = arith.constant 3.200000e+01 : f32
    %276 = vector.broadcast %cst_95 : f32 to vector<8x1xf32>
    %277 = arith.divf %275, %276 : vector<8x1xf32>
    %cst_96 = arith.constant 9.99999974E-6 : f32
    %278 = vector.broadcast %cst_96 : f32 to vector<8x1xf32>
    %279 = arith.addf %277, %278 : vector<8x1xf32>
    %280 = math.rsqrt %279 : vector<8x1xf32>
    %281 = vector.broadcast %280 : vector<8x1xf32> to vector<8x32xf32>
    %282 = arith.mulf %271, %281 : vector<8x32xf32>
    %283 = vector.broadcast %272 : vector<1x32xf32> to vector<8x32xf32>
    %284 = arith.mulf %282, %283 : vector<8x32xf32>
    %285 = arith.truncf %284 : vector<8x32xf32> to vector<8x32xbf16>
    %c0_97 = arith.constant 0 : index
    %c0_98 = arith.constant 0 : index
    %286 = vector.load %arg9[%c0_97, %c0_98] : memref<32x128xbf16, #tpu.memory_space<vmem>>, vector<32x128xbf16>
    %cst_99 = arith.constant dense<0.000000e+00> : vector<8x128xf32>
    %287 = tpu.matmul %285, %286, %cst_99 {dimension_numbers = #tpu.dot_dimension_numbers<[1], [0], [0], [1], [0, 0, 1, 1], [], []>} : vector<8x32xbf16>, vector<32x128xbf16>, vector<8x128xf32> -> vector<8x128xf32>
    %c0_100 = arith.constant 0 : index
    %c0_101 = arith.constant 0 : index
    %288 = vector.load %arg10[%c0_100, %c0_101] : memref<8x128xf32, #tpu.memory_space<vmem>>, vector<8x128xf32>
    tpu.vector_store %arg10[%c0_100, %c0_101], %287 {strides = array<i32>} : memref<8x128xf32, #tpu.memory_space<vmem>>, vector<8x128xf32>,
    return
  }
}

</mosaic_0001>

<bundles_post_ra>
// kernel: tile.11
= control target key start
LH: loop header
LB: loop body
LE: loop exit
PB: predicated region body
PF: predicated region fallthrough
CT: control target
= control target key end

     0   :  { %vm36_vm0 = vcmask 1047556   ;;  %s81_s22 = smov 8   ;;  %s82_s23 = smov 16   ;;  %vm38_vm1 = vcmask 64512   ;;  %vm48_vm2 = vcmask 261312   ;;  %vm58_vm3 = vcmask 195712   ;;  %s133_s0 = inlined_call_operand.vmem [shape: f32[8,4,8], index: 0, kind: input, shape index: {}]   ;;  %s134_s1 = inlined_call_operand.vmem [shape: f32[8,32], index: 1, kind: output, shape index: {}]  }
   0x1   :  { %v70_v0 = vld [vmem:[%s133_s0 + $0x1c] sm:$0xf]  ;;  %v71_v1 = vld [vmem:[%s133_s0 + $0x18] sm:$0xf]  ;;  %v72_v2 = vld [vmem:[%s133_s0 + $0x14] sm:$0xf] }
   0x2   :  { %7 = vst [vmem:[#allocation0 + $0x38] sm:$0xf] %v70_v0  ;;  %v73_v3 = vld [vmem:[%s133_s0 + $0x10] sm:$0xf]  ;;  %v74_v4 = vld [vmem:[%s133_s0 + $0xc] sm:$0xf] }
   0x3   :  { %11 = vst [vmem:[#allocation0 + $0x30] sm:$0xf] %v71_v1  ;;  %v75_v5 = vld [vmem:[%s133_s0 + $0x8] sm:$0xf]  ;;  %v76_v6 = vld [vmem:[%s133_s0 + $0x4] sm:$0xf] }
   0x4   :  { %15 = vst [vmem:[#allocation0 + $0x28] sm:$0xf] %v72_v2  ;;  %v32_v7 = vld [vmem:[%s133_s0] sm:$0xf]  ;;  %s80_s0 = smov 24   ;;  %vm68_vm4 = vcmask 130112  }
   0x5   :  { %19 = vst [vmem:[#allocation0 + $0x20] sm:$0xf] %v73_v3 }
   0x6   :  { %23 = vst [vmem:[#allocation0 + $0x18] sm:$0xf] %v74_v4 }
   0x7   :  { %27 = vst [vmem:[#allocation0 + $0x10] sm:$0xf] %v75_v5 }
   0x8   :  { %31 = vst [vmem:[#allocation0 + $0x8] sm:$0xf] %v76_v6 }
   0x9   :  { %33 = vst [vmem:[#allocation0] sm:$0xf] %v32_v7 }
   0xc   :  { %v43_v8 = vld [vmem:[#allocation0 + $0x3] ss:$8 sm:$0xf0]   ;;  %v63_v9 = vld [vmem:[#allocation0 + $0x1] ss:$8 sm:$0xf0]  }
   0xd   :  { %v53_v15 = vld [vmem:[#allocation0 + $0x2] ss:$8 sm:$0xf0]   ;;  %v35_v18 = vld [vmem:[#allocation0] ss:$8 sm:$0xf0]  }
  0x10   :  { %v41_v10 = vld [vmem:[#allocation0 + $0x3] ss:$8 sm:$0xf]   ;;  %v61_v12 = vld [vmem:[#allocation0 + $0x1] ss:$8 sm:$0xf]  }
  0x11   :  { %v45_v11 = vsel %vm36_vm0, %v43_v8, %v41_v10  ;;  %v65_v13 = vsel %vm36_vm0, %v63_v9, %v61_v12  ;;  %v51_v14 = vld [vmem:[#allocation0 + $0x2] ss:$8 sm:$0xf]   ;;  %v34_v17 = vld [vmem:[#allocation0] ss:$8 sm:$0xf]  }
  0x12   :  { %46 = vrot.lane.b32.xlu0 %v45_v11, %s80_s0  ;;  %66 = vrot.lane.b32.xlu1 %v65_v13, %s81_s22  ;;  %v55_v16 = vsel %vm36_vm0, %v53_v15, %v51_v14  ;;  %v37_v19 = vsel %vm36_vm0, %v35_v18, %v34_v17 }
  0x13   :  { %39 = vst.msk [vmem:[%s134_s1] sm:$0xff] %vm38_vm1, %v37_v19  }
  0x1a   :  { %56 = vrot.lane.b32.xlu0 %v55_v16, %s82_s23 }
  0x84   :  { %v47_v20 = vpop.permute.xlu0 %46   ;;  %v67_v21 = vpop.permute.xlu1 %66  }
  0x85   :  { %49 = vst.msk [vmem:[%s134_s1] sm:$0xff] %vm48_vm2, %v47_v20  }
  0x8c   :  { %v57_v22 = vpop.permute.xlu0 %56  }
  0x8d   :  { %59 = vst.msk [vmem:[%s134_s1] sm:$0xff] %vm58_vm3, %v57_v22  }
  0x8e   :  { %69 = vst.msk [vmem:[%s134_s1] sm:$0xff] %vm68_vm4, %v67_v21  }

// kernel: _lambda_.1
= control target key start
LH: loop header
LB: loop body
LE: loop exit
PB: predicated region body
PF: predicated region fallthrough
CT: control target
= control target key end

     0   :  { %vm44_vm0 = vcmask 261120   ;;  %s1897_s0 = inlined_call_operand.vmem [shape: f32[8,32], index: 0, kind: input, shape index: {}]   ;;  %s1898_s1 = inlined_call_operand.vmem [shape: f32[8,32], index: 1, kind: input, shape index: {}]   ;;  %s1899_s2 = inlined_call_operand.vmem [shape: f32[8,32], index: 2, kind: input, shape index: {}]   ;;  %s1900_s3 = inlined_call_operand.vmem [shape: f32[8,8], index: 3, kind: input, shape index: {}]   ;;  %s1901_s4 = inlined_call_operand.vmem [shape: f32[5,32], index: 4, kind: input, shape index: {}]   ;;  %s1902_s5 = inlined_call_operand.vmem [shape: bf16[2,32,160], index: 5, kind: input, shape index: {}]   ;;  %s1903_s6 = inlined_call_operand.vmem [shape: bf16[2,32,32], index: 6, kind: input, shape index: {}]   ;;  %s1904_s7 = inlined_call_operand.vmem [shape: bf16[2,32,128], index: 7, kind: input, shape index: {}]   ;;  %s1905_s8 = inlined_call_operand.vmem [shape: bf16[2,64,32], index: 8, kind: input, shape index: {}]   ;;  %s1906_s9 = inlined_call_operand.vmem [shape: bf16[32,128], index: 9, kind: input, shape index: {}]   ;;  %s1907_s10 = inlined_call_operand.hbm [shape: f32[8,128], index: 10, kind: output, shape index: {}]  }
   0x1   :  { %v1583_v0 = vld [vmem:[%s1897_s0] sm:$0xff] }
   0x2   :  { %v43_v1 = vmul.f32 %v1583_v0, %v1583_v0 }
   0x3   :  { %15 = vsyncpa [#allocation3], 0  ;;  %v1511_v3 = vmov 32.0   ;;  %v1247_v7 = vld [vmem:[%s1902_s5 + $0x10] sm:$0xf]  ;;  %v1615_v21 = vld [vmem:[%s1898_s1] sm:$0xff] }
   0x4   :  { %v45_v2 = vsel %vm44_vm0, %v43_v1, 0.0  ;;  %1433 = vrcp.f32 %v1511_v3  ;;  %v1391_v8 = vld [vmem:[%s1902_s5 + $0x14] sm:$0xf0]  ;;  %v1390_v9 = vld [vmem:[%s1902_s5 + $0x14] sm:$0xf]  ;;  %v39_v22 = vld [vmem:[%s1899_s2] sm:$0xff] }
   0x5   :  { %46 = vadd.xlane.f32.xlu0 %v45_v2  ;;  %v1248_v10 = vor.u32 %v1391_v8, %v1247_v7  ;;  %v1249_v11 = vld [vmem:[%s1902_s5 + $0x18] sm:$0xf0]  ;;  %v1239_v12 = vld [vmem:[%s1902_s5] sm:$0xf]  ;;  %v1389_v13 = vld [vmem:[%s1902_s5 + $0x4] sm:$0xf0] }
   0x6   :  { %v1252_v14 = vor.u32 %v1390_v9, %v1249_v11  ;;  %v1388_v15 = vld [vmem:[%s1902_s5 + $0x4] sm:$0xf]  ;;  %v1241_v16 = vld [vmem:[%s1902_s5 + $0x8] sm:$0xf0]  ;;  %v1240_v18 = vor.u32 %v1389_v13, %v1239_v12  ;;  %s1512_s14 = smov 64   ;;  %s1513_s15 = smov 96  }
   0x7   :  { %104 = vmatpush.bf16.msra.mxu0 %v1248_v10  ;;  %v1244_v19 = vor.u32 %v1388_v15, %v1241_v16  ;;  %137 = vrot.lane.b32.xlu1 %v1615_v21, %s1512_s14  ;;  %s1514_s16 = smov 32   ;;  %v1428_v33 = vld [vmem:[%s1901_s4] ss:$0 sm:$0xff]  ;;  %vm205_vm5 = vcmask 1043456   ;;  %s1515_s17 = smov 56   ;;  %vm157_vm6 = vcmask 64512  }
   0x8   :  { %117 = vmatpush.bf16.msra.mxu1 %v1252_v14  ;;  %126 = vrot.lane.b32.xlu2 %v39_v22, %s1514_s16  ;;  %s1516_s0 = smov 120   ;;  %s1517_s18 = smov 48  }
   0x9   :  { %s1518_s19 = smov 40   ;;  %s1519_s20 = smov 104  }
   0xa   :  { %v1434_v4 = vpop.eup %1433  ;;  %s1520_s23 = smov 112   ;;  %s1522_s24 = smov 8  }
   0xb   :  { %v49_v5 = vmul.f32 32.0, %v1434_v4  ;;  %105 = vmatpush.bf16.msra.mxu0 %v1240_v18  ;;  %vm53_vm1 = vweird.f32 %v1434_v4  ;;  %s1523_s25 = smov 24   ;;  %s1228_s1 = sshll.u32 %s1907_s10, 4  ;;  %s1229_s1 = int_to_ptr.hbm [resolvable:$true] %s1228_s1 }
   0xc   :  { %118 = vmatpush.bf16.msra.mxu1 %v1244_v19 }
   0xd   :  { %v50_v6 = vsub.f32 1.0, %v49_v5  ;;  %v1661_v5 = vld [vmem:[%s1900_s3] sm:$0xff]  ;;  %s1521_s3 = smov 16  }
   0xf   :  { %v51_v17 = vmul.f32 %v1434_v4, %v50_v6 }
  0x11   :  { %v52_v20 = vadd.f32 %v1434_v4, %v51_v17 }
  0x13   :  { %v1620_v23 = vsel %vm53_vm1, %v1434_v4, %v52_v20 }
  0x19   :  { %141 = vrot.lane.b32.xlu0 %v39_v22, %s1513_s15 }
  0x62   :  { %v1640_v44 = vpop.permute.xlu2 %126 }
  0x78   :  { %v47_v24 = vpop.xlane.xlu0 %46 }
  0x79   :  { %v55_v25 = vmul.f32 %v1620_v23, %v47_v24  ;;  %v1644_v48 = vpop.permute.xlu1 %137 }
  0x7b   :  { %v56_v26 = vadd.f32 1e-05, %v55_v25 }
  0x7d   :  { %1435 = vrsqrt.f32 %v56_v26  ;;  %vm63_vm3 = vweird.f32 %v56_v26 }
  0x83   :  { %v1436_v27 = vpop.eup %1435 }
  0x84   :  { %v58_v28 = vmul.f32 %v1436_v27, %v56_v26  ;;  %vm64_vm2 = vweird.f32 %v1436_v27 }
  0x85   :  { %vm65_vm4 = vmor %vm63_vm3, %vm64_vm2 }
  0x86   :  { %v59_v29 = vmul.f32 %v1436_v27, %v58_v28 }
  0x88   :  { %v60_v30 = vmul.f32 0.5, %v59_v29 }
  0x8a   :  { %v61_v31 = vsub.f32 1.5, %v60_v30 }
  0x8b   :  { %v1632_v38 = vpop.permute.xlu0 %141 }
  0x8c   :  { %v62_v32 = vmul.f32 %v1436_v27, %v61_v31 }
  0x8e   :  { %v66_v34 = vsel %vm65_vm4, %v1436_v27, %v62_v32 }
  0x8f   :  { %v67_v35 = vmul.f32 %v66_v34, %v1583_v0 }
  0x91   :  { %v69_v36 = vmul.f32 %v1428_v33, %v67_v35 }
  0x93   :  { %v70_v37 = vpack.c.bf16 %v69_v36, %v69_v36 }
  0x95   :  { %1253 = vmatmul.msk.bf16.vlgmr.msra.gmra.mxu0 %vm44_vm0, %v70_v37  ;;  %1254 = vmatmul.msk.bf16.vlgmr.msra.gmra.mxu1 %vm44_vm0, %v70_v37 }
 0x112   :  { %v107_v39 = vpop.f32.mrf.mxu0  ;;  %v120_v40 = vpop.f32.mrf.mxu1 }
 0x113   :  { %v1634_v41 = vpack.c.bf16 %v120_v40, %v120_v40  ;;  %v144_v42 = vmul.f32 %v1632_v38, %v107_v39  ;;  %v129_v47 = vmul.f32 %v1640_v44, %v107_v39  ;;  %v140_v49 = vmul.f32 %v1644_v48, %v107_v39 }
 0x114   :  { %v124_v55 = vmul.f32 %v107_v39, %v1615_v21 }
 0x115   :  { %146 = vrot.lane.b32.xlu1 %v144_v42, %s1513_s15  ;;  %v207_v43 = vsel %vm205_vm5, %v1634_v41, 0  ;;  %v274_v37 = vunpack.c.l.b16 %v1634_v41 }
 0x116   :  { %216 = vmatpush.bf16.msra.mxu3 %v207_v43 }
 0x117   :  { %v275_v39 = vpack.c.b16 %v274_v37, %v274_v37 }
 0x11a   :  { %v109_v45 = vpop.f32.mrf.mxu0  ;;  %v122_v46 = vpop.f32.mrf.mxu1 }
 0x11d   :  { %131 = vrot.lane.b32.xlu1 %v129_v47, %s1513_s15 }
 0x187   :  { %v147_v50 = vpop.permute.xlu1 %146 }
 0x188   :  { %v149_v51 = vadd.f32 %v147_v50, %v140_v49 }
 0x18a   :  { %v150_v52 = vpack.c.bf16 %v149_v51, %v149_v51 }
 0x18c   :  { %v153_v53 = vunpack.c.l.b16 %v150_v52 }
 0x18e   :  { %v154_v54 = vpack.c.b16 %v153_v53, %v153_v53 }
 0x18f   :  { %v132_v56 = vpop.permute.xlu1 %131 }
 0x190   :  { %v134_v57 = vadd.f32 %v132_v56, %v124_v55  ;;  %227 = vrot.lane.b32.xlu0 %v154_v54, %s1515_s17  ;;  %155 = vrot.lane.b32.xlu2 %v154_v54, %s1512_s14 }
 0x192   :  { %v135_v58 = vpack.c.bf16 %v134_v57, %v134_v57 }
 0x194   :  { %v223_v59 = vunpack.c.l.b16 %v135_v58 }
 0x196   :  { %v224_v60 = vpack.c.b16 %v223_v59, %v223_v59 }
 0x198   :  { %225 = vrot.lane.b32.xlu0 %v224_v60, %s1516_s0 }
 0x1a0   :  { %299 = vrot.lane.b32.xlu0 %v154_v54, %s1517_s18 }
 0x1a8   :  { %368 = vrot.lane.b32.xlu0 %v154_v54, %s1518_s19 }
 0x1b0   :  { %366 = vrot.lane.b32.xlu0 %v224_v60, %s1519_s20 }
 0x1ea   :  { %v156_v61 = vpop.permute.xlu2 %155 }
 0x1eb   :  { %v162_v62 = vsel %vm157_vm6, %v156_v61, 0 }
 0x1ec   :  { %171 = vmatpush.bf16.xpose.msra.mxu2 %v162_v62 }
 0x1f3   :  { %1255 = vmatmul.msk.bf16.vlgmr.msra.gmra.mxu2 %vm157_vm6, %v135_v58 }
 0x202   :  { %v228_v63 = vpop.permute.xlu0 %227 }
 0x203   :  { %v233_v1 = vsel %vm157_vm6, %v228_v63, 0 }
 0x204   :  { %242 = vmatpush.bf16.xpose.msrb.mxu3 %v233_v1 }
 0x20a   :  { %v226_v2 = vpop.permute.xlu0 %225 }
 0x212   :  { %v300_v3 = vpop.permute.xlu0 %299 }
 0x213   :  { %v305_v4 = vsel %vm157_vm6, %v300_v3, 0 }
 0x214   :  { %314 = vmatpush.bf16.xpose.msrb.mxu1 %v305_v4 }
 0x21a   :  { %v369_v34 = vpop.permute.xlu0 %368 }
 0x21b   :  { %v374_v36 = vsel %vm157_vm6, %v369_v34, 0 }
 0x222   :  { %v367_v40 = vpop.permute.xlu0 %366 }
 0x276   :  { %v173_v6 = vpop.f32.mrf.mxu2 }
 0x277   :  { %v174_v7 = vadd.f32 %v173_v6, %v1661_v5 }
 0x279   :  { %v177_v8 = vsel %vm157_vm6, %v174_v7, -inf }
 0x27a   :  { %178 = vmax.xlane.f32.xlu2 %v177_v8 }
 0x27e   :  { %v175_v9 = vpop.f32.mrf.mxu2 }
 0x292   :  { %297 = vrot.lane.b32.xlu2 %v224_v60, %s1520_s23 }
 0x2ed   :  { %v179_v10 = vpop.xlane.xlu2 %178 }
 0x2ee   :  { %v180_v11 = vsub.f32 %v174_v7, %v179_v10 }
 0x2f0   :  { %v181_v12 = vmul.f32 1.442695, %v180_v11 }
 0x2f2   :  { %1437 = vpow2.f32 %v181_v12 }
 0x2f5   :  { %v298_v13 = vpop.permute.xlu2 %297 }
 0x2f6   :  { %1259 = vmatmul.msk.bf16.vlgmr.msrb.gmra.mxu1 %vm157_vm6, %v298_v13 }
 0x2f8   :  { %v1438_v14 = vpop.eup %1437 }
 0x2f9   :  { %v183_v15 = vsel %vm157_vm6, %v1438_v14, 0.0 }
 0x2fa   :  { %184 = vadd.xlane.f32.xlu1 %v183_v15 }
 0x36d   :  { %v185_v16 = vpop.xlane.xlu1 %184 }
 0x36e   :  { %1439 = vrcp.f32 %v185_v16  ;;  %v197_v25 = vand.u32 2147483648, %v185_v16  ;;  %v195_v27 = vand.u32 2147483647, %v185_v16  ;;  %vm191_vm8 = vweird.f32 %v185_v16 }
 0x370   :  { %v198_v30 = vor.u32 1.1754944e-38, %v197_v25  ;;  %vm196_vm10 = vcmp.eq.f32.partialorder %v195_v27, 8.507059e+37 }
 0x373   :  { %v316_v17 = vpop.f32.mrf.mxu1 }
 0x374   :  { %v1440_v18 = vpop.eup %1439  ;;  %v317_v19 = vadd.f32 %v316_v17, %v1661_v5 }
 0x375   :  { %v187_v20 = vmul.f32 %v1440_v18, %v185_v16  ;;  %vm192_vm7 = vweird.f32 %v1440_v18 }
 0x376   :  { %v320_v22 = vsel %vm157_vm6, %v317_v19, -inf  ;;  %vm193_vm9 = vmor %vm191_vm8, %vm192_vm7 }
 0x377   :  { %v188_v24 = vsub.f32 1.0, %v187_v20  ;;  %321 = vmax.xlane.f32.xlu0 %v320_v22 }
 0x379   :  { %v189_v26 = vmul.f32 %v1440_v18, %v188_v24 }
 0x37b   :  { %v318_v28 = vpop.f32.mrf.mxu1  ;;  %v190_v29 = vadd.f32 %v1440_v18, %v189_v26 }
 0x37d   :  { %v194_v31 = vsel %vm193_vm9, %v1440_v18, %v190_v29 }
 0x37e   :  { %v199_v32 = vsel %vm196_vm10, %v198_v30, %v194_v31  ;;  %vm448_vm10 = vcmask 130048  }
 0x37f   :  { %v200_v33 = vmul.f32 %v1438_v14, %v199_v32 }
 0x381   :  { %v201_v35 = vpack.c.bf16 %v200_v33, %v200_v33 }
 0x383   :  { %1256 = vmatmul.msk.bf16.vlgmr.msra.gmra.mxu3 %vm157_vm6, %v201_v35 }
 0x384   :  { %383 = vmatpush.bf16.xpose.msra.mxu3 %v374_v36 }
 0x38b   :  { %345 = vrot.lane.b32.xlu0 %v275_v39, %s1520_s23 }
 0x393   :  { %1257 = vmatmul.msk.bf16.vlgmr.msrb.gmra.mxu3 %vm157_vm6, %v226_v2 }
 0x3a3   :  { %1261 = vmatmul.msk.bf16.vlgmr.msra.gmra.mxu3 %vm157_vm6, %v367_v40 }
 0x3ea   :  { %v322_v42 = vpop.xlane.xlu0 %321 }
 0x3eb   :  { %v323_v52 = vsub.f32 %v317_v19, %v322_v42 }
 0x3ed   :  { %v324_v53 = vmul.f32 1.442695, %v323_v52 }
 0x3ef   :  { %1441 = vpow2.f32 %v324_v53 }
 0x3f5   :  { %v1442_v57 = vpop.eup %1441 }
 0x3f6   :  { %v326_v59 = vsel %vm157_vm6, %v1442_v57, 0.0 }
 0x3fd   :  { %v346_v43 = vpop.permute.xlu0 %345 }
 0x3fe   :  { %v351_v45 = vsel %vm205_vm5, %v346_v43, 0 }
 0x3ff   :  { %360 = vmatpush.bf16.msrb.mxu2 %v351_v45 }
 0x406   :  { %v1677_v46 = vpop.f32.mrf.mxu3 }
 0x40e   :  { %v220_v47 = vpop.f32.mrf.mxu3 }
 0x416   :  { %v244_v49 = vpop.f32.mrf.mxu3 }
 0x417   :  { %v245_v50 = vadd.f32 %v244_v49, %v1661_v5 }
 0x419   :  { %v248_v41 = vsel %vm157_vm6, %v245_v50, -inf }
 0x41a   :  { %249 = vmax.xlane.f32.xlu1 %v248_v41 }
 0x41e   :  { %v246_v51 = vpop.f32.mrf.mxu3 }
 0x426   :  { %v385_v54 = vpop.f32.mrf.mxu3 }
 0x427   :  { %v386_v55 = vadd.f32 %v385_v54, %v1661_v5 }
 0x429   :  { %v389_v56 = vsel %vm157_vm6, %v386_v55, -inf }
 0x42a   :  { %390 = vmax.xlane.f32.xlu1 %v389_v56 }
 0x42e   :  { %v387_v58 = vpop.f32.mrf.mxu3 }
 0x432   :  { %327 = vadd.xlane.f32.xlu1 %v326_v59 }
 0x48d   :  { %v250_v60 = vpop.xlane.xlu1 %249 }
 0x48e   :  { %v251_v61 = vsub.f32 %v245_v50, %v250_v60 }
 0x490   :  { %v252_v62 = vmul.f32 1.442695, %v251_v61 }
 0x492   :  { %1443 = vpow2.f32 %v252_v62 }
 0x498   :  { %v1444_v63 = vpop.eup %1443 }
 0x499   :  { %v254_v1 = vsel %vm157_vm6, %v1444_v63, 0.0 }
 0x49a   :  { %255 = vadd.xlane.f32.xlu2 %v254_v1  ;;  %v1392_v1 = vld [vmem:[%s1903_s6] sm:$0xff] }
 0x49d   :  { %v391_v2 = vpop.xlane.xlu1 %390 }
 0x49e   :  { %v392_v3 = vsub.f32 %v386_v55, %v391_v2 }
 0x4a0   :  { %v393_v4 = vmul.f32 1.442695, %v392_v3 }
 0x4a2   :  { %1445 = vpow2.f32 %v393_v4 }
 0x4a5   :  { %v328_v6 = vpop.xlane.xlu1 %327 }
 0x4a6   :  { %1447 = vrcp.f32 %v328_v6  ;;  %v340_v12 = vand.u32 2147483648, %v328_v6  ;;  %v338_v14 = vand.u32 2147483647, %v328_v6  ;;  %vm334_vm12 = vweird.f32 %v328_v6 }
 0x4a8   :  { %v1685_v7 = vpop.eup %1445  ;;  %v341_v16 = vor.u32 1.1754944e-38, %v340_v12  ;;  %vm339_vm14 = vcmp.eq.f32.partialorder %v338_v14, 8.507059e+37  ;;  %v1395_v14 = vld [vmem:[%s1904_s7 + $0x8] sm:$0xff] }
 0x4a9   :  { %v395_v8 = vsel %vm157_vm6, %v1685_v7, 0.0  ;;  %531 = vmatpush.bf16.msra.mxu2 %v1395_v14 }
 0x4aa   :  { %396 = vadd.xlane.f32.xlu1 %v395_v8 }
 0x4ac   :  { %v1448_v9 = vpop.eup %1447 }
 0x4ad   :  { %v330_v10 = vmul.f32 %v1448_v9, %v328_v6  ;;  %vm335_vm11 = vweird.f32 %v1448_v9 }
 0x4ae   :  { %vm336_vm13 = vmor %vm334_vm12, %vm335_vm11  ;;  %vm450_vm11 = vcmask 195584  }
 0x4af   :  { %v331_v11 = vsub.f32 1.0, %v330_v10 }
 0x4b1   :  { %v332_v13 = vmul.f32 %v1448_v9, %v331_v11 }
 0x4b2   :  { %414 = vrot.lane.b32.xlu2 %v275_v39, %s1519_s20 }
 0x4b3   :  { %v333_v15 = vadd.f32 %v1448_v9, %v332_v13 }
 0x4b5   :  { %v337_v17 = vsel %vm336_vm13, %v1448_v9, %v333_v15  ;;  %v1394_v15 = vld [vmem:[%s1904_s7] sm:$0xff] }
 0x4b6   :  { %v342_v18 = vsel %vm339_vm14, %v341_v16, %v337_v17  ;;  %532 = vmatpush.bf16.msra.mxu2 %v1394_v15 }
 0x4b7   :  { %v343_v19 = vmul.f32 %v1442_v57, %v342_v18 }
 0x4b9   :  { %v344_v20 = vpack.c.bf16 %v343_v19, %v343_v19 }
 0x4bb   :  { %1260 = vmatmul.msk.bf16.vlgmr.msrb.gmra.mxu2 %vm157_vm6, %v344_v20 }
 0x4c3   :  { %276 = vrot.lane.b32.xlu1 %v275_v39, %s1516_s0 }
 0x50d   :  { %v256_v22 = vpop.xlane.xlu2 %255 }
 0x50e   :  { %1449 = vrcp.f32 %v256_v22  ;;  %v268_v31 = vand.u32 2147483648, %v256_v22  ;;  %vm262_vm1 = vweird.f32 %v256_v22  ;;  %v266_v32 = vand.u32 2147483647, %v256_v22 }
 0x510   :  { %v269_v35 = vor.u32 1.1754944e-38, %v268_v31  ;;  %vm267_vm3 = vcmp.eq.f32.partialorder %v266_v32, 8.507059e+37  ;;  %v1399_v31 = vld [vmem:[%s1905_s8 + $0x18] sm:$0xff]  ;;  %v1398_v32 = vld [vmem:[%s1905_s8 + $0x10] sm:$0xff] }
 0x511   :  { %604 = vmatpush.bf16.msrb.mxu3 %v1399_v31 }
 0x514   :  { %v1450_v24 = vpop.eup %1449 }
 0x515   :  { %v258_v25 = vmul.f32 %v1450_v24, %v256_v22  ;;  %vm263_vm15 = vweird.f32 %v1450_v24  ;;  %v415_v39 = vpop.permute.xlu2 %414  ;;  %605 = vmatpush.bf16.msrb.mxu3 %v1398_v32 }
 0x516   :  { %vm264_vm2 = vmor %vm262_vm1, %vm263_vm15  ;;  %v420_v47 = vsel %vm205_vm5, %v415_v39, 0 }
 0x517   :  { %v259_v26 = vsub.f32 1.0, %v258_v25 }
 0x519   :  { %v260_v28 = vmul.f32 %v1450_v24, %v259_v26  ;;  %v1429_v26 = vld [vmem:[%s1901_s4 + $0x1] ss:$0 sm:$0xff] }
 0x51b   :  { %v261_v29 = vadd.f32 %v1450_v24, %v260_v28 }
 0x51d   :  { %v397_v27 = vpop.xlane.xlu1 %396  ;;  %v265_v34 = vsel %vm264_vm2, %v1450_v24, %v261_v29 }
 0x51e   :  { %1451 = vrcp.f32 %v397_v27  ;;  %v270_v36 = vsel %vm267_vm3, %v269_v35, %v265_v34  ;;  %v409_v41 = vand.u32 2147483648, %v397_v27  ;;  %vm403_vm7 = vweird.f32 %v397_v27 }
 0x51f   :  { %v271_v40 = vmul.f32 %v1444_v63, %v270_v36  ;;  %v407_v51 = vand.u32 2147483647, %v397_v27  ;;  %v1393_v63 = vld [vmem:[%s1903_s6 + $0x8] sm:$0xff] }
 0x520   :  { %v410_v54 = vor.u32 1.1754944e-38, %v409_v41  ;;  %478 = vmatpush.bf16.msra.mxu1 %v1393_v63 }
 0x521   :  { %v272_v49 = vpack.c.bf16 %v271_v40, %v271_v40  ;;  %vm408_vm9 = vcmp.eq.f32.partialorder %v407_v51, 8.507059e+37 }
 0x524   :  { %v1452_v30 = vpop.eup %1451  ;;  %479 = vmatpush.bf16.msra.mxu1 %v1392_v1  ;;  %v1312_v1 = vld [vmem:[%s1902_s5 + $0x30] sm:$0xf] }
 0x525   :  { %v399_v33 = vmul.f32 %v1452_v30, %v397_v27  ;;  %vm404_vm4 = vweird.f32 %v1452_v30 }
 0x526   :  { %vm405_vm8 = vmor %vm403_vm7, %vm404_vm4  ;;  %vm596_vm4 = vcmask 523264  }
 0x527   :  { %v400_v37 = vsub.f32 1.0, %v399_v33  ;;  %v1397_v33 = vld [vmem:[%s1905_s8 + $0x8] sm:$0xff] }
 0x528   :  { %606 = vmatpush.bf16.msrb.mxu3 %v1397_v33 }
 0x529   :  { %v401_v43 = vmul.f32 %v1452_v30, %v400_v37 }
 0x52b   :  { %v402_v50 = vadd.f32 %v1452_v30, %v401_v43 }
 0x52d   :  { %v406_v52 = vsel %vm405_vm8, %v1452_v30, %v402_v50 }
 0x52e   :  { %v411_v55 = vsel %vm408_vm9, %v410_v54, %v406_v52 }
 0x52f   :  { %v412_v56 = vmul.f32 %v1685_v7, %v411_v55 }
 0x531   :  { %v413_v58 = vpack.c.bf16 %v412_v56, %v412_v56 }
 0x535   :  { %v277_v42 = vpop.permute.xlu1 %276 }
 0x536   :  { %v282_v45 = vsel %vm205_vm5, %v277_v42, 0  ;;  %v1396_v42 = vld [vmem:[%s1905_s8] sm:$0xff] }
 0x537   :  { %291 = vmatpush.bf16.msrb.mxu0 %v282_v45  ;;  %607 = vmatpush.bf16.msrb.mxu3 %v1396_v42 }
 0x53a   :  { %1258 = vmatmul.msk.bf16.vlgmr.msrb.gmra.mxu0 %vm157_vm6, %v272_v49 }
 0x53b   :  { %429 = vmatpush.bf16.msra.mxu0 %v420_v47 }
 0x53e   :  { %v362_v53 = vpop.f32.mrf.mxu2 }
 0x53f   :  { %440 = vrot.lane.b32.xlu0 %v362_v53, %s1521_s3 }
 0x546   :  { %v364_v57 = vpop.f32.mrf.mxu2 }
 0x54a   :  { %1262 = vmatmul.msk.bf16.vlgmr.msra.gmra.mxu0 %vm157_vm6, %v413_v58 }
 0x5b1   :  { %v441_v4 = vpop.permute.xlu0 %440 }
 0x5b7   :  { %v293_v59 = vpop.f32.mrf.mxu0 }
 0x5b8   :  { %436 = vrot.lane.b32.xlu1 %v293_v59, %s1522_s24 }
 0x5bf   :  { %v295_v60 = vpop.f32.mrf.mxu0 }
 0x5c7   :  { %v431_v61 = vpop.f32.mrf.mxu0 }
 0x5c8   :  { %444 = vrot.lane.b32.xlu1 %v431_v61, %s1523_s25 }
 0x5cf   :  { %v433_v62 = vpop.f32.mrf.mxu0 }
 0x62a   :  { %v437_v2 = vpop.permute.xlu1 %436 }
 0x62b   :  { %v447_v3 = vsel %vm157_vm6, %v1677_v46, %v437_v2  ;;  %v1403_v2 = vld [vmem:[%s1902_s5 + $0x34] sm:$0xf0] }
 0x62c   :  { %v449_v6 = vsel %vm448_vm10, %v447_v3, %v441_v4  ;;  %v1402_v3 = vld [vmem:[%s1902_s5 + $0x34] sm:$0xf]  ;;  %v1313_v4 = vor.u32 %v1403_v2, %v1312_v1 }
 0x62e   :  { %670 = vmatpush.bf16.msrb.mxu0 %v1313_v4 }
 0x63a   :  { %v445_v7 = vpop.permute.xlu1 %444 }
 0x63b   :  { %v451_v8 = vsel %vm450_vm11, %v449_v6, %v445_v7  ;;  %v1314_v6 = vld [vmem:[%s1902_s5 + $0x38] sm:$0xf0] }
 0x63c   :  { %v452_v9 = vpack.c.bf16 %v451_v8, %v451_v8  ;;  %v1317_v7 = vor.u32 %v1402_v3, %v1314_v6  ;;  %v1304_v8 = vld [vmem:[%s1902_s5 + $0x20] sm:$0xf] }
 0x63e   :  { %1271 = vmatmul.msk.bf16.vlgmr.msra.gmra.mxu1 %vm44_vm0, %v452_v9  ;;  %v1401_v9 = vld [vmem:[%s1902_s5 + $0x24] sm:$0xf0] }
 0x63f   :  { %683 = vmatpush.bf16.msrb.mxu1 %v1317_v7 }
 0x6bb   :  { %v481_v10 = vpop.f32.mrf.mxu1 }
 0x6bc   :  { %v1712_v11 = vadd.f32 %v481_v10, %v1583_v0  ;;  %v1400_v10 = vld [vmem:[%s1902_s5 + $0x24] sm:$0xf] }
 0x6be   :  { %v486_v12 = vmul.f32 %v1712_v11, %v1712_v11 }
 0x6c0   :  { %v487_v46 = vsel %vm44_vm0, %v486_v12, 0.0  ;;  %v1306_v12 = vld [vmem:[%s1902_s5 + $0x28] sm:$0xf0] }
 0x6c1   :  { %488 = vadd.xlane.f32.xlu0 %v487_v46  ;;  %v1309_v46 = vor.u32 %v1400_v10, %v1306_v12 }
 0x6c3   :  { %v483_v13 = vpop.f32.mrf.mxu1  ;;  %684 = vmatpush.bf16.msrb.mxu1 %v1309_v46 }
 0x734   :  { %v489_v16 = vpop.xlane.xlu0 %488 }
 0x735   :  { %v490_v0 = vmul.f32 %v489_v16, %v1620_v23 }
 0x737   :  { %v491_v17 = vadd.f32 1e-05, %v490_v0 }
 0x739   :  { %1453 = vrsqrt.f32 %v491_v17  ;;  %vm498_vm13 = vweird.f32 %v491_v17 }
 0x73f   :  { %v1454_v18 = vpop.eup %1453 }
 0x740   :  { %v493_v19 = vmul.f32 %v1454_v18, %v491_v17  ;;  %vm499_vm12 = vweird.f32 %v1454_v18 }
 0x741   :  { %vm500_vm14 = vmor %vm498_vm13, %vm499_vm12 }
 0x742   :  { %v494_v20 = vmul.f32 %v1454_v18, %v493_v19 }
 0x744   :  { %v495_v22 = vmul.f32 0.5, %v494_v20 }
 0x746   :  { %v496_v24 = vsub.f32 1.5, %v495_v22  ;;  %v1430_v22 = vld [vmem:[%s1901_s4 + $0x2] ss:$0 sm:$0xff] }
 0x748   :  { %v497_v25 = vmul.f32 %v1454_v18, %v496_v24 }
 0x74a   :  { %v501_v27 = vsel %vm500_vm14, %v1454_v18, %v497_v25 }
 0x74b   :  { %v502_v28 = vmul.f32 %v501_v27, %v1712_v11 }
 0x74d   :  { %v504_v29 = vmul.f32 %v1429_v26, %v502_v28 }
 0x74f   :  { %v505_v30 = vpack.c.bf16 %v504_v29, %v504_v29 }
 0x751   :  { %1280 = vmatmul.msk.bf16.vlgmr.msra.gmra.mxu2 %vm44_vm0, %v505_v30 }
 0x7d4   :  { %v534_v34 = vpop.f32.mrf.mxu2 }
 0x7d5   :  { %559 = vrot.lane.b32.xlu1 %v534_v34, %s1512_s14  ;;  %v538_v36 = vsub.f32 0.0, %v534_v34 }
 0x7d7   :  { %v539_v37 = vmul.f32 1.442695, %v538_v36 }
 0x7d9   :  { %1455 = vpow2.f32 %v539_v37 }
 0x7dc   :  { %v536_v35 = vpop.f32.mrf.mxu2 }
 0x7df   :  { %v1456_v39 = vpop.eup %1455 }
 0x7e0   :  { %v541_v40 = vadd.f32 1.0, %v1456_v39 }
 0x7e2   :  { %1457 = vrcp.f32 %v541_v40  ;;  %v553_v41 = vand.u32 2147483648, %v541_v40  ;;  %vm547_vm1 = vweird.f32 %v541_v40  ;;  %v551_v51 = vand.u32 2147483647, %v541_v40 }
 0x7e4   :  { %v554_v53 = vor.u32 1.1754944e-38, %v553_v41  ;;  %vm552_vm3 = vcmp.eq.f32.partialorder %v551_v51, 8.507059e+37 }
 0x7e8   :  { %v1458_v43 = vpop.eup %1457 }
 0x7e9   :  { %v543_v45 = vmul.f32 %v1458_v43, %v541_v40  ;;  %vm548_vm15 = vweird.f32 %v1458_v43 }
 0x7ea   :  { %vm549_vm2 = vmor %vm547_vm1, %vm548_vm15 }
 0x7eb   :  { %v544_v47 = vsub.f32 1.0, %v543_v45 }
 0x7ed   :  { %v545_v49 = vmul.f32 %v1458_v43, %v544_v47 }
 0x7ef   :  { %v546_v50 = vadd.f32 %v1458_v43, %v545_v49 }
 0x7f1   :  { %v550_v52 = vsel %vm549_vm2, %v1458_v43, %v546_v50 }
 0x7f2   :  { %v555_v54 = vsel %vm552_vm3, %v554_v53, %v550_v52 }
 0x7f3   :  { %v557_v55 = vmul.f32 %v555_v54, %v534_v34 }
 0x847   :  { %v560_v56 = vpop.permute.xlu1 %559 }
 0x848   :  { %v562_v57 = vmul.f32 %v560_v56, %v557_v55 }
 0x84a   :  { %v563_v58 = vpack.c.bf16 %v562_v57, %v562_v57 }
 0x84c   :  { %1297 = vmatmul.msk.bf16.vlgmr.msrb.gmra.mxu3 %vm596_vm4, %v563_v58 }
 0x8cf   :  { %v609_v59 = vpop.f32.mrf.mxu3 }
 0x8d0   :  { %v1744_v60 = vadd.f32 %v609_v59, %v1712_v11  ;;  %v1305_v11 = vor.u32 %v1401_v9, %v1304_v8 }
 0x8d2   :  { %v616_v61 = vmul.f32 %v1744_v60, %v1744_v60  ;;  %671 = vmatpush.bf16.msrb.mxu0 %v1305_v11 }
 0x8d4   :  { %v617_v62 = vsel %vm44_vm0, %v616_v61, 0.0 }
 0x8d5   :  { %618 = vadd.xlane.f32.xlu2 %v617_v62 }
 0x8d7   :  { %v611_v63 = vpop.f32.mrf.mxu3 }
 0x948   :  { %v619_v13 = vpop.xlane.xlu2 %618 }
 0x949   :  { %v620_v14 = vmul.f32 %v619_v13, %v1620_v23 }
 0x94b   :  { %v621_v15 = vadd.f32 1e-05, %v620_v14 }
 0x94d   :  { %1459 = vrsqrt.f32 %v621_v15  ;;  %vm628_vm8 = vweird.f32 %v621_v15 }
 0x953   :  { %v1460_v16 = vpop.eup %1459 }
 0x954   :  { %v623_v0 = vmul.f32 %v1460_v16, %v621_v15  ;;  %vm629_vm7 = vweird.f32 %v1460_v16 }
 0x955   :  { %vm630_vm9 = vmor %vm628_vm8, %vm629_vm7 }
 0x956   :  { %v624_v17 = vmul.f32 %v1460_v16, %v623_v0 }
 0x958   :  { %v625_v18 = vmul.f32 0.5, %v624_v17 }
 0x95a   :  { %v626_v19 = vsub.f32 1.5, %v625_v18 }
 0x95c   :  { %v627_v20 = vmul.f32 %v1460_v16, %v626_v19 }
 0x95e   :  { %v631_v24 = vsel %vm630_vm9, %v1460_v16, %v627_v20 }
 0x95f   :  { %v632_v25 = vmul.f32 %v631_v24, %v1744_v60 }
 0x961   :  { %v634_v26 = vmul.f32 %v1430_v22, %v632_v25 }
 0x963   :  { %v635_v27 = vpack.c.bf16 %v634_v26, %v634_v26 }
 0x965   :  { %1318 = vmatmul.msk.bf16.vlgmr.msrb.gmra.mxu0 %vm44_vm0, %v635_v27  ;;  %1319 = vmatmul.msk.bf16.vlgmr.msrb.gmra.mxu1 %vm44_vm0, %v635_v27 }
 0x9e2   :  { %v673_v28 = vpop.f32.mrf.mxu0  ;;  %v686_v29 = vpop.f32.mrf.mxu1 }
 0x9e3   :  { %v1780_v30 = vpack.c.bf16 %v686_v29, %v686_v29  ;;  %v699_v31 = vmul.f32 %v673_v28, %v1632_v38  ;;  %v691_v35 = vmul.f32 %v673_v28, %v1640_v44  ;;  %v698_v36 = vmul.f32 %v673_v28, %v1644_v48 }
 0x9e4   :  { %v690_v38 = vmul.f32 %v673_v28, %v1615_v21 }
 0x9e5   :  { %v760_v32 = vsel %vm205_vm5, %v1780_v30, 0  ;;  %701 = vrot.lane.b32.xlu1 %v699_v31, %s1513_s15 }
 0x9e6   :  { %769 = vmatpush.bf16.msra.mxu3 %v760_v32 }
 0x9ea   :  { %v675_v33 = vpop.f32.mrf.mxu0  ;;  %v688_v34 = vpop.f32.mrf.mxu1 }
 0x9eb   :  { %v827_v33 = vunpack.c.l.b16 %v1780_v30 }
 0x9ed   :  { %693 = vrot.lane.b32.xlu1 %v691_v35, %s1513_s15  ;;  %v828_v35 = vpack.c.b16 %v827_v33, %v827_v33 }
 0xa57   :  { %v702_v37 = vpop.permute.xlu1 %701 }
 0xa58   :  { %v704_v39 = vadd.f32 %v702_v37, %v698_v36 }
 0xa5a   :  { %v705_v40 = vpack.c.bf16 %v704_v39, %v704_v39 }
 0xa5c   :  { %v708_v42 = vunpack.c.l.b16 %v705_v40 }
 0xa5e   :  { %v709_v43 = vpack.c.b16 %v708_v42, %v708_v42 }
 0xa5f   :  { %v694_v45 = vpop.permute.xlu1 %693 }
 0xa60   :  { %v696_v47 = vadd.f32 %v694_v45, %v690_v38  ;;  %921 = vrot.lane.b32.xlu2 %v709_v43, %s1518_s19  ;;  %710 = vrot.lane.b32.xlu1 %v709_v43, %s1512_s14 }
 0xa62   :  { %v697_v49 = vpack.c.bf16 %v696_v47, %v696_v47 }
 0xa64   :  { %v776_v50 = vunpack.c.l.b16 %v697_v49 }
 0xa66   :  { %v777_v44 = vpack.c.b16 %v776_v50, %v776_v50 }
 0xa68   :  { %780 = vrot.lane.b32.xlu1 %v709_v43, %s1515_s17  ;;  %778 = vrot.lane.b32.xlu0 %v777_v44, %s1516_s0 }
 0xa70   :  { %852 = vrot.lane.b32.xlu1 %v709_v43, %s1517_s18 }
 0xa78   :  { %850 = vrot.lane.b32.xlu1 %v777_v44, %s1520_s23 }
 0xa80   :  { %919 = vrot.lane.b32.xlu1 %v777_v44, %s1519_s20 }
 0xaba   :  { %v922_v41 = vpop.permute.xlu2 %921 }
 0xabb   :  { %v927_v53 = vsel %vm157_vm6, %v922_v41, 0 }
 0xad2   :  { %v711_v21 = vpop.permute.xlu1 %710 }
 0xad3   :  { %v716_v48 = vsel %vm157_vm6, %v711_v21, 0 }
 0xad4   :  { %725 = vmatpush.bf16.xpose.msrb.mxu2 %v716_v48 }
 0xada   :  { %v781_v51 = vpop.permute.xlu1 %780  ;;  %v779_v54 = vpop.permute.xlu0 %778 }
 0xadb   :  { %v786_v52 = vsel %vm157_vm6, %v781_v51, 0  ;;  %1320 = vmatmul.msk.bf16.vlgmr.msrb.gmra.mxu2 %vm157_vm6, %v697_v49 }
 0xadc   :  { %795 = vmatpush.bf16.xpose.msra.mxu0 %v786_v52 }
 0xae2   :  { %v853_v55 = vpop.permute.xlu1 %852 }
 0xae3   :  { %v858_v56 = vsel %vm157_vm6, %v853_v55, 0  ;;  %1322 = vmatmul.msk.bf16.vlgmr.msra.gmra.mxu0 %vm157_vm6, %v779_v54 }
 0xae4   :  { %936 = vmatpush.bf16.xpose.msrb.mxu0 %v927_v53  ;;  %867 = vmatpush.bf16.xpose.msra.mxu2 %v858_v56 }
 0xaea   :  { %v851_v57 = vpop.permute.xlu1 %850 }
 0xaeb   :  { %1324 = vmatmul.msk.bf16.vlgmr.msra.gmra.mxu2 %vm157_vm6, %v851_v57 }
 0xaf2   :  { %v920_v58 = vpop.permute.xlu1 %919 }
 0xaf3   :  { %1326 = vmatmul.msk.bf16.vlgmr.msrb.gmra.mxu0 %vm157_vm6, %v920_v58 }
 0xb5e   :  { %v727_v59 = vpop.f32.mrf.mxu2 }
 0xb5f   :  { %v728_v61 = vadd.f32 %v727_v59, %v1661_v5 }
 0xb60   :  { %v797_v62 = vpop.f32.mrf.mxu0 }
 0xb61   :  { %v798_v63 = vadd.f32 %v797_v62, %v1661_v5  ;;  %v731_v1 = vsel %vm157_vm6, %v728_v61, -inf }
 0xb62   :  { %732 = vmax.xlane.f32.xlu0 %v731_v1 }
 0xb63   :  { %v801_v2 = vsel %vm157_vm6, %v798_v63, -inf }
 0xb64   :  { %802 = vmax.xlane.f32.xlu1 %v801_v2 }
 0xb66   :  { %v729_v3 = vpop.f32.mrf.mxu2 }
 0xb68   :  { %v799_v4 = vpop.f32.mrf.mxu0 }
 0xb6e   :  { %v869_v6 = vpop.f32.mrf.mxu2 }
 0xb6f   :  { %v870_v7 = vadd.f32 %v869_v6, %v1661_v5 }
 0xb70   :  { %v938_v8 = vpop.f32.mrf.mxu0 }
 0xb71   :  { %v939_v9 = vadd.f32 %v938_v8, %v1661_v5  ;;  %v873_v10 = vsel %vm157_vm6, %v870_v7, -inf }
 0xb72   :  { %874 = vmax.xlane.f32.xlu2 %v873_v10 }
 0xb73   :  { %v942_v11 = vsel %vm157_vm6, %v939_v9, -inf }
 0xb74   :  { %943 = vmax.xlane.f32.xlu0 %v942_v11 }
 0xb76   :  { %v871_v12 = vpop.f32.mrf.mxu2 }
 0xb78   :  { %v940_v46 = vpop.f32.mrf.mxu0 }
 0xbd5   :  { %v733_v13 = vpop.xlane.xlu0 %732 }
 0xbd6   :  { %v734_v14 = vsub.f32 %v728_v61, %v733_v13 }
 0xbd7   :  { %v803_v15 = vpop.xlane.xlu1 %802 }
 0xbd8   :  { %v735_v16 = vmul.f32 1.442695, %v734_v14  ;;  %v804_v0 = vsub.f32 %v798_v63, %v803_v15 }
 0xbda   :  { %1461 = vpow2.f32 %v735_v16  ;;  %v805_v17 = vmul.f32 1.442695, %v804_v0 }
 0xbdc   :  { %1463 = vpow2.f32 %v805_v17 }
 0xbe0   :  { %v1462_v18 = vpop.eup %1461 }
 0xbe1   :  { %v737_v19 = vsel %vm157_vm6, %v1462_v18, 0.0 }
 0xbe2   :  { %v1464_v5 = vpop.eup %1463  ;;  %738 = vadd.xlane.f32.xlu1 %v737_v19 }
 0xbe3   :  { %v807_v20 = vsel %vm157_vm6, %v1464_v5, 0.0 }
 0xbe4   :  { %808 = vadd.xlane.f32.xlu0 %v807_v20 }
 0xbe5   :  { %v875_v22 = vpop.xlane.xlu2 %874 }
 0xbe6   :  { %v876_v24 = vsub.f32 %v870_v7, %v875_v22 }
 0xbe7   :  { %v944_v25 = vpop.xlane.xlu0 %943 }
 0xbe8   :  { %v877_v26 = vmul.f32 1.442695, %v876_v24  ;;  %v945_v27 = vsub.f32 %v939_v9, %v944_v25 }
 0xbea   :  { %1465 = vpow2.f32 %v877_v26  ;;  %v946_v28 = vmul.f32 1.442695, %v945_v27 }
 0xbec   :  { %1467 = vpow2.f32 %v946_v28 }
 0xbf0   :  { %v1815_v29 = vpop.eup %1465 }
 0xbf1   :  { %v879_v31 = vsel %vm157_vm6, %v1815_v29, 0.0 }
 0xbf2   :  { %v1819_v32 = vpop.eup %1467  ;;  %880 = vadd.xlane.f32.xlu2 %v879_v31 }
 0xbf3   :  { %v948_v34 = vsel %vm157_vm6, %v1819_v32, 0.0 }
 0xbf4   :  { %949 = vadd.xlane.f32.xlu1 %v948_v34 }
 0xbf8   :  { %829 = vrot.lane.b32.xlu0 %v828_v35, %s1516_s0 }
 0xc0a   :  { %898 = vrot.lane.b32.xlu2 %v828_v35, %s1520_s23 }
 0xc0d   :  { %967 = vrot.lane.b32.xlu1 %v828_v35, %s1519_s20 }
 0xc55   :  { %v739_v36 = vpop.xlane.xlu1 %738 }
 0xc56   :  { %1469 = vrcp.f32 %v739_v36  ;;  %v751_v38 = vand.u32 2147483648, %v739_v36  ;;  %v749_v47 = vand.u32 2147483647, %v739_v36  ;;  %vm745_vm13 = vweird.f32 %v739_v36 }
 0xc57   :  { %v809_v37 = vpop.xlane.xlu0 %808 }
 0xc58   :  { %1471 = vrcp.f32 %v809_v37  ;;  %v821_v50 = vand.u32 2147483648, %v809_v37  ;;  %v819_v48 = vand.u32 2147483647, %v809_v37  ;;  %v752_v41 = vor.u32 1.1754944e-38, %v751_v38 }
 0xc59   :  { %vm750_vm1 = vcmp.eq.f32.partialorder %v749_v47, 8.507059e+37  ;;  %vm815_vm2 = vweird.f32 %v809_v37 }
 0xc5a   :  { %v822_v55 = vor.u32 1.1754944e-38, %v821_v50  ;;  %vm820_vm7 = vcmp.eq.f32.partialorder %v819_v48, 8.507059e+37 }
 0xc5c   :  { %v1470_v39 = vpop.eup %1469 }
 0xc5d   :  { %v741_v40 = vmul.f32 %v1470_v39, %v739_v36  ;;  %vm746_vm12 = vweird.f32 %v1470_v39 }
 0xc5e   :  { %v1472_v42 = vpop.eup %1471  ;;  %vm747_vm15 = vmor %vm745_vm13, %vm746_vm12 }
 0xc5f   :  { %v742_v30 = vsub.f32 1.0, %v741_v40  ;;  %v811_v43 = vmul.f32 %v1472_v42, %v809_v37  ;;  %vm816_vm14 = vweird.f32 %v1472_v42 }
 0xc60   :  { %vm817_vm3 = vmor %vm815_vm2, %vm816_vm14 }
 0xc61   :  { %v743_v45 = vmul.f32 %v1470_v39, %v742_v30  ;;  %v812_v49 = vsub.f32 1.0, %v811_v43  ;;  %v1404_v30 = vld [vmem:[%s1903_s6 + $0x10] sm:$0xff] }
 0xc63   :  { %v744_v44 = vadd.f32 %v1470_v39, %v743_v45  ;;  %v813_v21 = vmul.f32 %v1472_v42, %v812_v49 }
 0xc65   :  { %v748_v51 = vsel %vm747_vm15, %v1470_v39, %v744_v44  ;;  %v814_v52 = vadd.f32 %v1472_v42, %v813_v21  ;;  %v881_v53 = vpop.xlane.xlu2 %880 }
 0xc66   :  { %v753_v54 = vsel %vm750_vm1, %v752_v41, %v748_v51  ;;  %1473 = vrcp.f32 %v881_v53  ;;  %v893_v11 = vand.u32 2147483648, %v881_v53  ;;  %v891_v46 = vand.u32 2147483647, %v881_v53 }
 0xc67   :  { %v754_v56 = vmul.f32 %v1462_v18, %v753_v54  ;;  %v818_v57 = vsel %vm817_vm3, %v1472_v42, %v814_v52  ;;  %v950_v58 = vpop.xlane.xlu1 %949  ;;  %vm887_vm9 = vweird.f32 %v881_v53  ;;  %v1405_v42 = vld [vmem:[%s1903_s6 + $0x18] sm:$0xff]  ;;  %v1406_v54 = vld [vmem:[%s1904_s7 + $0x10] sm:$0xff] }
 0xc68   :  { %v823_v59 = vsel %vm820_vm7, %v822_v55, %v818_v57  ;;  %1475 = vrcp.f32 %v950_v58  ;;  %v894_v16 = vor.u32 1.1754944e-38, %v893_v11  ;;  %vm892_vm14 = vcmp.eq.f32.partialorder %v891_v46, 8.507059e+37  ;;  %1030 = vmatpush.bf16.msrb.mxu2 %v1405_v42 }
 0xc69   :  { %v824_v61 = vmul.f32 %v1464_v5, %v823_v59  ;;  %v755_v63 = vpack.c.bf16 %v754_v56, %v754_v56  ;;  %v962_v18 = vand.u32 2147483648, %v950_v58  ;;  %vm956_vm15 = vweird.f32 %v950_v58 }
 0xc6a   :  { %v830_v62 = vpop.permute.xlu0 %829  ;;  %v960_v5 = vand.u32 2147483647, %v950_v58 }
 0xc6b   :  { %v835_v1 = vsel %vm205_vm5, %v830_v62, 0  ;;  %1321 = vmatmul.msk.bf16.vlgmr.msra.gmra.mxu3 %vm157_vm6, %v755_v63  ;;  %v825_v6 = vpack.c.bf16 %v824_v61, %v824_v61  ;;  %v963_v24 = vor.u32 1.1754944e-38, %v962_v18 }
 0xc6c   :  { %v1474_v2 = vpop.eup %1473  ;;  %844 = vmatpush.bf16.msra.mxu1 %v835_v1  ;;  %vm961_vm2 = vcmp.eq.f32.partialorder %v960_v5, 8.507059e+37  ;;  %1031 = vmatpush.bf16.msrb.mxu2 %v1404_v30  ;;  %v1431_v1 = vld [vmem:[%s1901_s4 + $0x3] ss:$0 sm:$0xff] }
 0xc6d   :  { %v883_v3 = vmul.f32 %v1474_v2, %v881_v53  ;;  %v899_v4 = vpop.permute.xlu2 %898  ;;  %vm888_vm8 = vweird.f32 %v1474_v2  ;;  %v1407_v53 = vld [vmem:[%s1904_s7 + $0x18] sm:$0xff] }
 0xc6e   :  { %v1476_v7 = vpop.eup %1475  ;;  %v904_v8 = vsel %vm205_vm5, %v899_v4, 0  ;;  %vm889_vm12 = vmor %vm887_vm9, %vm888_vm8 }
 0xc6f   :  { %v884_v9 = vsub.f32 1.0, %v883_v3  ;;  %v952_v10 = vmul.f32 %v1476_v7, %v950_v58  ;;  %1323 = vmatmul.msk.bf16.vlgmr.msra.gmra.mxu1 %vm157_vm6, %v825_v6  ;;  %913 = vmatpush.bf16.msrb.mxu3 %v904_v8  ;;  %vm957_vm13 = vweird.f32 %v1476_v7  ;;  %v1410_v8 = vld [vmem:[%s1905_s8 + $0x30] sm:$0xff] }
 0xc70   :  { %vm958_vm1 = vmor %vm956_vm15, %vm957_vm13 }
 0xc71   :  { %v885_v12 = vmul.f32 %v1474_v2, %v884_v9  ;;  %v953_v13 = vsub.f32 1.0, %v952_v10  ;;  %v1409_v9 = vld [vmem:[%s1905_s8 + $0x28] sm:$0xff] }
 0xc73   :  { %v886_v14 = vadd.f32 %v1474_v2, %v885_v12  ;;  %v954_v15 = vmul.f32 %v1476_v7, %v953_v13  ;;  %1084 = vmatpush.bf16.msra.mxu3 %v1407_v53 }
 0xc75   :  { %v890_v0 = vsel %vm889_vm12, %v1474_v2, %v886_v14  ;;  %v955_v17 = vadd.f32 %v1476_v7, %v954_v15  ;;  %v1408_v15 = vld [vmem:[%s1905_s8 + $0x20] sm:$0xff] }
 0xc76   :  { %v895_v19 = vsel %vm892_vm14, %v894_v16, %v890_v0 }
 0xc77   :  { %v896_v20 = vmul.f32 %v1815_v29, %v895_v19  ;;  %v959_v22 = vsel %vm958_vm1, %v1476_v7, %v955_v17  ;;  %1085 = vmatpush.bf16.msra.mxu3 %v1406_v54  ;;  %v1411_v7 = vld [vmem:[%s1905_s8 + $0x38] sm:$0xff] }
 0xc78   :  { %v964_v26 = vsel %vm961_vm2, %v963_v24, %v959_v22  ;;  %1157 = vmatpush.bf16.msra.mxu0 %v1411_v7 }
 0xc79   :  { %v897_v25 = vpack.c.bf16 %v896_v20, %v896_v20  ;;  %v965_v27 = vmul.f32 %v1819_v32, %v964_v26 }
 0xc7b   :  { %1325 = vmatmul.msk.bf16.vlgmr.msrb.gmra.mxu3 %vm157_vm6, %v897_v25  ;;  %v966_v33 = vpack.c.bf16 %v965_v27, %v965_v27 }
 0xc7c   :  { %1158 = vmatpush.bf16.msra.mxu0 %v1410_v8 }
 0xc7f   :  { %v968_v28 = vpop.permute.xlu1 %967 }
 0xc80   :  { %v973_v31 = vsel %vm205_vm5, %v968_v28, 0  ;;  %1159 = vmatpush.bf16.msra.mxu0 %v1409_v9 }
 0xc81   :  { %982 = vmatpush.bf16.msrb.mxu1 %v973_v31 }
 0xc84   :  { %1327 = vmatmul.msk.bf16.vlgmr.msrb.gmra.mxu1 %vm157_vm6, %v966_v33  ;;  %1160 = vmatpush.bf16.msra.mxu0 %v1408_v15 }
 0xcec   :  { %v846_v34 = vpop.f32.mrf.mxu1 }
 0xced   :  { %989 = vrot.lane.b32.xlu0 %v846_v34, %s1522_s24 }
 0xcee   :  { %v771_v29 = vpop.f32.mrf.mxu3 }
 0xcf4   :  { %v848_v35 = vpop.f32.mrf.mxu1 }
 0xcf6   :  { %v773_v36 = vpop.f32.mrf.mxu3 }
 0xcfe   :  { %v915_v37 = vpop.f32.mrf.mxu3 }
 0xcff   :  { %993 = vrot.lane.b32.xlu2 %v915_v37, %s1521_s3  ;;  %v1413_v37 = vld [vmem:[%s1906_s9 + $0x8] sm:$0xff] }
 0xd00   :  { %1213 = vmatpush.bf16.msra.mxu1 %v1413_v37 }
 0xd01   :  { %v984_v39 = vpop.f32.mrf.mxu1 }
 0xd02   :  { %997 = vrot.lane.b32.xlu0 %v984_v39, %s1523_s25  ;;  %v1412_v39 = vld [vmem:[%s1906_s9] sm:$0xff]  ;;  %s1524_s9 = smov [#allocation2]  }
 0xd03   :  { %s1226_s12 = sshll.u32 %s1524_s9, 4  ;;  %s1227_s12 = int_to_ptr.vmem [resolvable:$true] %s1226_s12 }
 0xd04   :  { %1214 = vmatpush.bf16.msra.mxu1 %v1412_v39 }
 0xd06   :  { %v917_v32 = vpop.f32.mrf.mxu3 }
 0xd09   :  { %v986_v40 = vpop.f32.mrf.mxu1 }
 0xd59   :  { %v994_v45 = vpop.permute.xlu2 %993 }
 0xd5f   :  { %v990_v43 = vpop.permute.xlu0 %989 }
 0xd60   :  { %v1000_v38 = vsel %vm157_vm6, %v771_v29, %v990_v43 }
 0xd61   :  { %v1001_v47 = vsel %vm448_vm10, %v1000_v38, %v994_v45 }
 0xd74   :  { %v998_v49 = vpop.permute.xlu0 %997 }
 0xd75   :  { %v1002_v50 = vsel %vm450_vm11, %v1001_v47, %v998_v49 }
 0xd76   :  { %v1003_v44 = vpack.c.bf16 %v1002_v50, %v1002_v50  ;;  %v1432_v50 = vld [vmem:[%s1901_s4 + $0x4] ss:$0 sm:$0xff] }
 0xd78   :  { %1340 = vmatmul.msk.bf16.vlgmr.msrb.gmra.mxu2 %vm44_vm0, %v1003_v44 }
 0xdfb   :  { %v1033_v21 = vpop.f32.mrf.mxu2 }
 0xdfc   :  { %v1850_v48 = vadd.f32 %v1033_v21, %v1744_v60 }
 0xdfe   :  { %v1038_v41 = vmul.f32 %v1850_v48, %v1850_v48 }
 0xe00   :  { %v1039_v51 = vsel %vm44_vm0, %v1038_v41, 0.0 }
 0xe01   :  { %1040 = vadd.xlane.f32.xlu1 %v1039_v51 }
 0xe03   :  { %v1035_v52 = vpop.f32.mrf.mxu2 }
 0xe74   :  { %v1041_v55 = vpop.xlane.xlu1 %1040 }
 0xe75   :  { %v1042_v60 = vmul.f32 %v1041_v55, %v1620_v23 }
 0xe77   :  { %v1043_v56 = vadd.f32 1e-05, %v1042_v60 }
 0xe79   :  { %1477 = vrsqrt.f32 %v1043_v56  ;;  %vm1050_vm6 = vweird.f32 %v1043_v56 }
 0xe7f   :  { %v1478_v57 = vpop.eup %1477 }
 0xe80   :  { %v1045_v58 = vmul.f32 %v1478_v57, %v1043_v56  ;;  %vm1051_vm5 = vweird.f32 %v1478_v57 }
 0xe81   :  { %vm1052_vm10 = vmor %vm1050_vm6, %vm1051_vm5 }
 0xe82   :  { %v1046_v59 = vmul.f32 %v1478_v57, %v1045_v58 }
 0xe84   :  { %v1047_v61 = vmul.f32 0.5, %v1046_v59 }
 0xe86   :  { %v1048_v62 = vsub.f32 1.5, %v1047_v61 }
 0xe88   :  { %v1049_v63 = vmul.f32 %v1478_v57, %v1048_v62 }
 0xe8a   :  { %v1053_v2 = vsel %vm1052_vm10, %v1478_v57, %v1049_v63 }
 0xe8b   :  { %v1054_v3 = vmul.f32 %v1053_v2, %v1850_v48 }
 0xe8d   :  { %v1056_v4 = vmul.f32 %v1431_v1, %v1054_v3 }
 0xe8f   :  { %v1057_v6 = vpack.c.bf16 %v1056_v4, %v1056_v4 }
 0xe91   :  { %1353 = vmatmul.msk.bf16.vlgmr.msra.gmra.mxu3 %vm44_vm0, %v1057_v6 }
 0xf14   :  { %v1087_v10 = vpop.f32.mrf.mxu3 }
 0xf15   :  { %1112 = vrot.lane.b32.xlu2 %v1087_v10, %s1512_s14  ;;  %v1091_v12 = vsub.f32 0.0, %v1087_v10 }
 0xf17   :  { %v1092_v46 = vmul.f32 1.442695, %v1091_v12 }
 0xf19   :  { %1479 = vpow2.f32 %v1092_v46 }
 0xf1c   :  { %v1089_v11 = vpop.f32.mrf.mxu3 }
 0xf1f   :  { %v1480_v13 = vpop.eup %1479 }
 0xf20   :  { %v1094_v14 = vadd.f32 1.0, %v1480_v13 }
 0xf22   :  { %1481 = vrcp.f32 %v1094_v14  ;;  %v1106_v5 = vand.u32 2147483648, %v1094_v14  ;;  %vm1100_vm3 = vweird.f32 %v1094_v14  ;;  %v1104_v20 = vand.u32 2147483647, %v1094_v14 }
 0xf24   :  { %v1107_v24 = vor.u32 1.1754944e-38, %v1106_v5  ;;  %vm1105_vm8 = vcmp.eq.f32.partialorder %v1104_v20, 8.507059e+37 }
 0xf28   :  { %v1482_v16 = vpop.eup %1481 }
 0xf29   :  { %v1096_v0 = vmul.f32 %v1482_v16, %v1094_v14  ;;  %vm1101_vm11 = vweird.f32 %v1482_v16 }
 0xf2a   :  { %vm1102_vm7 = vmor %vm1100_vm3, %vm1101_vm11 }
 0xf2b   :  { %v1097_v17 = vsub.f32 1.0, %v1096_v0 }
 0xf2d   :  { %v1098_v18 = vmul.f32 %v1482_v16, %v1097_v17 }
 0xf2f   :  { %v1099_v19 = vadd.f32 %v1482_v16, %v1098_v18 }
 0xf31   :  { %v1103_v22 = vsel %vm1102_vm7, %v1482_v16, %v1099_v19 }
 0xf32   :  { %v1108_v25 = vsel %vm1105_vm8, %v1107_v24, %v1103_v22 }
 0xf33   :  { %v1110_v26 = vmul.f32 %v1108_v25, %v1087_v10 }
 0xf6f   :  { %v1113_v27 = vpop.permute.xlu2 %1112 }
 0xf70   :  { %v1115_v28 = vmul.f32 %v1113_v27, %v1110_v26 }
 0xf72   :  { %v1116_v31 = vpack.c.bf16 %v1115_v28, %v1115_v28 }
 0xf74   :  { %1378 = vmatmul.msk.bf16.vlgmr.msra.gmra.mxu0 %vm596_vm4, %v1116_v31 }
 0xff1   :  { %v1162_v33 = vpop.f32.mrf.mxu0 }
 0xff2   :  { %v1166_v34 = vadd.f32 %v1162_v33, %v1850_v48 }
 0xff4   :  { %v1168_v29 = vmul.f32 %v1166_v34, %v1166_v34 }
 0xff6   :  { %v1169_v35 = vsel %vm44_vm0, %v1168_v29, 0.0 }
 0xff7   :  { %1170 = vadd.xlane.f32.xlu0 %v1169_v35 }
 0xff9   :  { %v1164_v36 = vpop.f32.mrf.mxu0 }
0x106a   :  { %v1171_v32 = vpop.xlane.xlu0 %1170 }
0x106b   :  { %v1172_v40 = vmul.f32 %v1171_v32, %v1620_v23 }
0x106d   :  { %v1173_v42 = vadd.f32 1e-05, %v1172_v40 }
0x106f   :  { %1483 = vrsqrt.f32 %v1173_v42  ;;  %vm1180_vm9 = vweird.f32 %v1173_v42 }
0x1075   :  { %v1484_v30 = vpop.eup %1483 }
0x1076   :  { %v1175_v43 = vmul.f32 %v1484_v30, %v1173_v42  ;;  %vm1181_vm4 = vweird.f32 %v1484_v30 }
0x1077   :  { %vm1182_vm12 = vmor %vm1180_vm9, %vm1181_vm4 }
0x1078   :  { %v1176_v38 = vmul.f32 %v1484_v30, %v1175_v43 }
0x107a   :  { %v1177_v45 = vmul.f32 0.5, %v1176_v38 }
0x107c   :  { %v1178_v47 = vsub.f32 1.5, %v1177_v45 }
0x107e   :  { %v1179_v49 = vmul.f32 %v1484_v30, %v1178_v47 }
0x1080   :  { %v1183_v44 = vsel %vm1182_vm12, %v1484_v30, %v1179_v49 }
0x1081   :  { %v1184_v21 = vmul.f32 %v1183_v44, %v1166_v34 }
0x1083   :  { %v1186_v48 = vmul.f32 %v1432_v50, %v1184_v21 }
0x1085   :  { %v1187_v41 = vpack.c.bf16 %v1186_v48, %v1186_v48 }
0x1087   :  { %1387 = vmatmul.msk.bf16.vlgmr.msra.gmra.mxu1 %vm44_vm0, %v1187_v41 }
0x1104   :  { %v1216_v23 = vpop.f32.mrf.mxu1 }
0x1105   :  { %1220 = vst [vmem:[#allocation2] sm:$0xff] %v1216_v23 }
0x1106   :  { %1231 = dma.vmem_to_hbm [thread:$0]  %s1227_s12, 128, %s1229_s1, [#allocation3]  }
0x110c   :  { %v1218_v51 = vpop.f32.mrf.mxu1 }
0x110d   :  { %1509 = dma.done.wait [#allocation3], 128  }
0x110e   :  { %1510 = vsyncadd [#allocation3], 4294967168 }
0x110f   :  { %1236 = vsyncpa [#allocation3], 1 }

</bundles_post_ra>
